<compile_context>
chip_gen: v6e
topology: v6e:2x2x1
jax: 0.10.0
libtpu: 0.0.40
codegen_flags: <defaults>
</compile_context>

<pallas_src>
import functools

import jax
import jax.numpy as jnp
from jax import lax
from jax.experimental import pallas as pl
from jax.experimental.pallas import tpu as pltpu


def _round_up(x, m):
    return ((x + m - 1) // m) * m


def custom_clip_kernel(ls_ref, x_ref, wimg_ref, bimg_ref, wfc1_ref, bfc1_ref,
                       ztT_ref, out_ref, acc_ref):
    k = pl.program_id(0)

    # ---- init accumulator on first K tile ----
    @pl.when(k == 0)
    def _():
        acc_ref[...] = jnp.zeros_like(acc_ref)

    # ---- image-encoder linear: stream one K tile of (x, w_img), accumulate f32 ----
    acc_ref[...] += jnp.dot(x_ref[...], wimg_ref[...],
                            preferred_element_type=jnp.float32)        # (B, 512)

    # ---- finalize on last K tile ----
    @pl.when(k == pl.num_programs(0) - 1)
    def _():
        feat = acc_ref[...] + bimg_ref[...]                            # (B, 512)

        # fc1 = nn.Linear(512, 128), f32 (small, runs once)
        z_i = jnp.dot(feat, wfc1_ref[...],
                      preferred_element_type=jnp.float32) + bfc1_ref[...]  # (B, 128)

        zt_T = ztT_ref[...]                                            # (128, P)

        # L2 normalize along the feature axis (axis -1 for z_i, axis 0 for z_t^T)
        zi_n = z_i * lax.rsqrt(jnp.sum(z_i * z_i, axis=-1, keepdims=True))
        zt_n = zt_T * lax.rsqrt(jnp.sum(zt_T * zt_T, axis=0, keepdims=True))

        # scores = zi_n @ zt_n.T  — zt already transposed, MXU-native contraction
        scores = jnp.dot(zi_n, zt_n, preferred_element_type=jnp.float32)  # (B, P)

        # argmax over dim=0 (batch axis), first occurrence on ties
        B = scores.shape[0]
        row_ids = lax.broadcasted_iota(jnp.int32, scores.shape, 0)     # (B, P)
        maxv = jnp.max(scores, axis=0, keepdims=True)                  # (1, P)
        cand = jnp.where(scores == maxv, row_ids, jnp.int32(B))        # sentinel B
        first = jnp.min(cand, axis=0, keepdims=True)                   # (1, P)
        sel = (cand == first).astype(jnp.float32)                      # (B, P) one-hot cols

        # logits = exp(logit_scale) * scores[max_idx]  via one-hot gather matmul:
        # (sel^T @ scores)[p, q] = scores[argmax_p, q]
        gathered = lax.dot_general(sel, scores, (((0,), (0,)), ((), ())),
                                   preferred_element_type=jnp.float32)  # (P, P)
        out_ref[...] = ls_ref[...] * gathered                           # (1,1) bcast

    # TODO(synk): F.gumbel_softmax(logits, tau=1, hard=False) in the reference is
    # computed and immediately discarded (stochastic, no effect on the return) — omitted.


@functools.partial(jax.jit, static_argnames=("block_k",))
def custom_clip_forward(image, params, *, block_k=1024):
    B = image.shape[0]
    x = image.reshape(B, -1).astype(jnp.float32)                       # (B, C*H*W)
    in_dim = x.shape[1]

    feat_dim = params["w_img"].shape[1]                                # 512
    proj_dim = params["w_fc1"].shape[1]                                # 128
    P = params["z_t"].shape[0]

    # ---- pad the contraction axis to a multiple of the K tile ----
    tk = min(block_k, _round_up(in_dim, 128))
    Kp = _round_up(in_dim, tk)
    w_img = params["w_img"].astype(jnp.float32)
    if Kp != in_dim:
        x = jnp.pad(x, ((0, 0), (0, Kp - in_dim)))
        w_img = jnp.pad(w_img, ((0, Kp - in_dim), (0, 0)))
    nk = Kp // tk

    # bf16 streams for the HBM-dominant tensors; f32 accumulation in-kernel.
    x_bf = x.astype(jnp.bfloat16)
    w_img_bf = w_img.astype(jnp.bfloat16)

    b_img = params["b_img"].astype(jnp.float32)                        # (1, 512)
    w_fc1 = params["w_fc1"].astype(jnp.float32)                        # (512, 128)
    b_fc1 = params["b_fc1"].astype(jnp.float32)                        # (1, 128)
    zt_T = params["z_t"].astype(jnp.float32).T                         # (128, P) pre-transposed
    ls = jnp.exp(params["logit_scale"]).reshape(1, 1).astype(jnp.float32)

    grid_spec = pltpu.PrefetchScalarGridSpec(
        num_scalar_prefetch=0,
        grid=(nk,),
        in_specs=[
            pl.BlockSpec((1, 1), lambda k: (0, 0)),            # exp(logit_scale)
            pl.BlockSpec((B, tk), lambda k: (0, k)),           # x, bf16, K-tiled
            pl.BlockSpec((tk, feat_dim), lambda k: (k, 0)),    # w_img, bf16, K-tiled
            pl.BlockSpec((1, feat_dim), lambda k: (0, 0)),     # b_img
            pl.BlockSpec((feat_dim, proj_dim), lambda k: (0, 0)),  # w_fc1 (f32, constant block)
            pl.BlockSpec((1, proj_dim), lambda k: (0, 0)),     # b_fc1
            pl.BlockSpec((proj_dim, P), lambda k: (0, 0)),     # z_t^T
        ],
        out_specs=pl.BlockSpec((P, P), lambda k: (0, 0)),
        scratch_shapes=[pltpu.VMEM((B, feat_dim), jnp.float32)],  # f32 feature accumulator
    )

    return pl.pallas_call(
        custom_clip_kernel,
        out_shape=jax.ShapeDtypeStruct((P, P), jnp.float32),
        grid_spec=grid_spec,
        compiler_params=pltpu.CompilerParams(
            dimension_semantics=("arbitrary",),                # K is a reduction axis
            vmem_limit_bytes=32 * 1024 * 1024,
        ),
    )(ls, x_bf, w_img_bf, b_img, w_fc1, b_fc1, zt_T)


def init_params(key, in_dim, feat_dim=512, proj_dim=128, num_classes=8):
    k1, k2, k3, k4, k5 = jax.random.split(key, 5)
    scale_img = 1.0 / jnp.sqrt(in_dim)
    scale_fc = 1.0 / jnp.sqrt(feat_dim)
    return {
        # synthetic image-encoder linear (stand-in for CLIP ViT)
        "w_img": (jax.random.normal(k1, (in_dim, feat_dim), jnp.float32) * scale_img),
        "b_img": (jax.random.normal(k2, (1, feat_dim), jnp.float32) * 0.01),
        # fc1 = nn.Linear(512, 128)
        "w_fc1": (jax.random.normal(k3, (feat_dim, proj_dim), jnp.float32) * scale_fc),
        "b_fc1": (jax.random.normal(k4, (1, proj_dim), jnp.float32) * 0.01),
        # prompt-learner / text features stand-in: (num_classes, 128)
        "z_t": jax.random.normal(k5, (num_classes, proj_dim), jnp.float32),
        # CLIP logit_scale parameter (log of 1/temperature), CLIP init ln(1/0.07)
        "logit_scale": jnp.asarray(jnp.log(1.0 / 0.07), jnp.float32),
    }


if __name__ == "__main__":
    key = jax.random.PRNGKey(0)
    k_img, k_par = jax.random.split(key)

    Bsz, C, H, W = 2, 4, 16, 16
    image = jax.random.normal(k_img, (Bsz, C, H, W), jnp.float32)   # NCHW

    params = init_params(k_par, in_dim=C * H * W, feat_dim=512,
                         proj_dim=128, num_classes=8)

    logits = custom_clip_forward(image, params)
    jax.block_until_ready(logits)
    assert logits.shape == (8, 8) and logits.dtype == jnp.float32
    assert bool(jnp.all(jnp.isfinite(logits)))
    print("KERNEL_OK")
</pallas_src>

<mosaic_0001>
module attributes {stable_mosaic.version = 11 : i64} {
  func.func @custom_clip_kernel(%arg0: i32, %arg1: memref<1x1xf32, #tpu.memory_space<vmem>>, %arg2: memref<2x1024xbf16, #tpu.memory_space<vmem>>, %arg3: memref<1024x512xbf16, #tpu.memory_space<vmem>>, %arg4: memref<1x512xf32, #tpu.memory_space<vmem>>, %arg5: memref<512x128xf32, #tpu.memory_space<vmem>>, %arg6: memref<1x128xf32, #tpu.memory_space<vmem>>, %arg7: memref<128x8xf32, #tpu.memory_space<vmem>>, %arg8: memref<8x8xf32, #tpu.memory_space<vmem>>, %arg9: memref<2x512xf32, #tpu.memory_space<vmem>>) attributes {dimension_semantics = [#tpu.dimension_semantics<arbitrary>], iteration_bounds = array<i64: 1>, scalar_prefetch = 0 : i64, scratch_operands = 1 : i64, tpu.core_type = #tpu.core_type<tc>, window_params = [{pipeline_mode = #tpu.pipeline_mode<synchronous>, transform_indices = @transform_0, window_bounds = array<i64: 1, 1>}, {transform_indices = @transform_1, window_bounds = array<i64: 2, 1024>}, {transform_indices = @transform_2, window_bounds = array<i64: 1024, 512>}, {pipeline_mode = #tpu.pipeline_mode<synchronous>, transform_indices = @transform_3, window_bounds = array<i64: 1, 512>}, {pipeline_mode = #tpu.pipeline_mode<synchronous>, transform_indices = @transform_4, window_bounds = array<i64: 512, 128>}, {pipeline_mode = #tpu.pipeline_mode<synchronous>, transform_indices = @transform_5, window_bounds = array<i64: 1, 128>}, {pipeline_mode = #tpu.pipeline_mode<synchronous>, transform_indices = @transform_6, window_bounds = array<i64: 128, 8>}, {pipeline_mode = #tpu.pipeline_mode<synchronous>, transform_indices = @transform_7, window_bounds = array<i64: 8, 8>}]} {
    %c0_i32 = arith.constant 0 : i32
    %0 = arith.cmpi eq, %arg0, %c0_i32 : i32
    %1 = arith.extui %0 : i1 to i32
    %c0_i32_0 = arith.constant 0 : i32
    %2 = arith.cmpi ne, %1, %c0_i32_0 : i32
    scf.if %2 {
      %cst_10 = arith.constant 0.000000e+00 : f32
      %12 = vector.broadcast %cst_10 : f32 to vector<2x512xf32>
      %c0_11 = arith.constant 0 : index
      %c0_12 = arith.constant 0 : index
      %13 = vector.load %arg9[%c0_11, %c0_12] : memref<2x512xf32, #tpu.memory_space<vmem>>, vector<2x512xf32>
      tpu.vector_store %arg9[%c0_11, %c0_12], %12 {strides = array<i32>} : memref<2x512xf32, #tpu.memory_space<vmem>>, vector<2x512xf32>,
    } else {
    }
    %c0 = arith.constant 0 : index
    %c0_1 = arith.constant 0 : index
    %3 = vector.load %arg9[%c0, %c0_1] : memref<2x512xf32, #tpu.memory_space<vmem>>, vector<2x512xf32>
    %c0_2 = arith.constant 0 : index
    %c0_3 = arith.constant 0 : index
    %4 = vector.load %arg2[%c0_2, %c0_3] : memref<2x1024xbf16, #tpu.memory_space<vmem>>, vector<2x1024xbf16>
    %c0_4 = arith.constant 0 : index
    %c0_5 = arith.constant 0 : index
    %5 = vector.load %arg3[%c0_4, %c0_5] : memref<1024x512xbf16, #tpu.memory_space<vmem>>, vector<1024x512xbf16>
    %cst = arith.constant dense<0.000000e+00> : vector<2x512xf32>
    %6 = tpu.matmul %4, %5, %cst {dimension_numbers = #tpu.dot_dimension_numbers<[1], [0], [0], [1], [0, 0, 1, 1], [], []>} : vector<2x1024xbf16>, vector<1024x512xbf16>, vector<2x512xf32> -> vector<2x512xf32>
    %7 = arith.addf %3, %6 : vector<2x512xf32>
    %c0_6 = arith.constant 0 : index
    %c0_7 = arith.constant 0 : index
    %8 = vector.load %arg9[%c0_6, %c0_7] : memref<2x512xf32, #tpu.memory_space<vmem>>, vector<2x512xf32>
    tpu.vector_store %arg9[%c0_6, %c0_7], %7 {strides = array<i32>} : memref<2x512xf32, #tpu.memory_space<vmem>>, vector<2x512xf32>,
    %c0_i32_8 = arith.constant 0 : i32
    %9 = arith.cmpi eq, %arg0, %c0_i32_8 : i32
    %10 = arith.extui %9 : i1 to i32
    %c0_i32_9 = arith.constant 0 : i32
    %11 = arith.cmpi ne, %10, %c0_i32_9 : i32
    scf.if %11 {
      %c0_10 = arith.constant 0 : index
      %c0_11 = arith.constant 0 : index
      %12 = vector.load %arg9[%c0_10, %c0_11] : memref<2x512xf32, #tpu.memory_space<vmem>>, vector<2x512xf32>
      %c0_12 = arith.constant 0 : index
      %c0_13 = arith.constant 0 : index
      %13 = vector.load %arg4[%c0_12, %c0_13] : memref<1x512xf32, #tpu.memory_space<vmem>>, vector<1x512xf32>
      %14 = vector.broadcast %13 : vector<1x512xf32> to vector<2x512xf32>
      %15 = arith.addf %12, %14 : vector<2x512xf32>
      %c0_14 = arith.constant 0 : index
      %c0_15 = arith.constant 0 : index
      %16 = vector.load %arg5[%c0_14, %c0_15] : memref<512x128xf32, #tpu.memory_space<vmem>>, vector<512x128xf32>
      %cst_16 = arith.constant dense<0.000000e+00> : vector<2x128xf32>
      %17 = tpu.matmul %15, %16, %cst_16 {dimension_numbers = #tpu.dot_dimension_numbers<[1], [0], [0], [1], [0, 0, 1, 1], [], []>} : vector<2x512xf32>, vector<512x128xf32>, vector<2x128xf32> -> vector<2x128xf32>
      %c0_17 = arith.constant 0 : index
      %c0_18 = arith.constant 0 : index
      %18 = vector.load %arg6[%c0_17, %c0_18] : memref<1x128xf32, #tpu.memory_space<vmem>>, vector<1x128xf32>
      %19 = vector.broadcast %18 : vector<1x128xf32> to vector<2x128xf32>
      %20 = arith.addf %17, %19 : vector<2x128xf32>
      %c0_19 = arith.constant 0 : index
      %c0_20 = arith.constant 0 : index
      %21 = vector.load %arg7[%c0_19, %c0_20] : memref<128x8xf32, #tpu.memory_space<vmem>>, vector<128x8xf32>
      %22 = arith.mulf %20, %20 : vector<2x128xf32>
      %cst_21 = arith.constant dense<0.000000e+00> : vector<2xf32>
      %23 = vector.multi_reduction <add>, %22, %cst_21 [1] : vector<2x128xf32> to vector<2xf32>
      %24 = vector.shape_cast %23 : vector<2xf32> to vector<2x1xf32>
      %25 = math.rsqrt %24 : vector<2x1xf32>
      %26 = vector.broadcast %25 : vector<2x1xf32> to vector<2x128xf32>
      %27 = arith.mulf %20, %26 : vector<2x128xf32>
      %28 = arith.mulf %21, %21 : vector<128x8xf32>
      %cst_22 = arith.constant dense<0.000000e+00> : vector<8xf32>
      %29 = vector.multi_reduction <add>, %28, %cst_22 [0] : vector<128x8xf32> to vector<8xf32>
      %30 = vector.shape_cast %29 : vector<8xf32> to vector<1x8xf32>
      %31 = math.rsqrt %30 : vector<1x8xf32>
      %32 = vector.broadcast %31 : vector<1x8xf32> to vector<128x8xf32>
      %33 = arith.mulf %21, %32 : vector<128x8xf32>
      %cst_23 = arith.constant dense<0.000000e+00> : vector<2x8xf32>
      %34 = tpu.matmul %27, %33, %cst_23 {dimension_numbers = #tpu.dot_dimension_numbers<[1], [0], [0], [1], [0, 0, 1, 1], [], []>} : vector<2x128xf32>, vector<128x8xf32>, vector<2x8xf32> -> vector<2x8xf32>
      %35 = tpu.iota {dimensions = array<i32: 0>} : vector<2x8xi32>
      %cst_24 = arith.constant dense<0xFF800000> : vector<8xf32>
      %36 = vector.multi_reduction <maximumf>, %34, %cst_24 [0] : vector<2x8xf32> to vector<8xf32>
      %37 = vector.shape_cast %36 : vector<8xf32> to vector<1x8xf32>
      %38 = vector.broadcast %37 : vector<1x8xf32> to vector<2x8xf32>
      %39 = arith.cmpf oeq, %34, %38 : vector<2x8xf32>
      %c2_i32 = arith.constant 2 : i32
      %40 = vector.broadcast %c2_i32 : i32 to vector<2x8xi32>
      %41 = arith.select %39, %35, %40 : vector<2x8xi1>, vector<2x8xi32>
      %cst_25 = arith.constant dense<2147483647> : vector<8xi32>
      %42 = vector.multi_reduction <minsi>, %41, %cst_25 [0] : vector<2x8xi32> to vector<8xi32>
      %43 = vector.shape_cast %42 : vector<8xi32> to vector<1x8xi32>
      %44 = vector.broadcast %43 : vector<1x8xi32> to vector<2x8xi32>
      %45 = arith.cmpi eq, %41, %44 : vector<2x8xi32>
      %46 = arith.extui %45 : vector<2x8xi1> to vector<2x8xi32>
      %47 = arith.sitofp %46 : vector<2x8xi32> to vector<2x8xf32>
      %cst_26 = arith.constant dense<0.000000e+00> : vector<8x8xf32>
      %48 = tpu.matmul %47, %34, %cst_26 {dimension_numbers = #tpu.dot_dimension_numbers<[0], [0], [1], [1], [0, 1, 1, 1], [], []>} : vector<2x8xf32>, vector<2x8xf32>, vector<8x8xf32> -> vector<8x8xf32>
      %c0_27 = arith.constant 0 : index
      %c0_28 = arith.constant 0 : index
      %49 = vector.load %arg1[%c0_27, %c0_28] : memref<1x1xf32, #tpu.memory_space<vmem>>, vector<1x1xf32>
      %50 = vector.broadcast %49 : vector<1x1xf32> to vector<8x8xf32>
      %51 = arith.mulf %50, %48 : vector<8x8xf32>
      %c0_29 = arith.constant 0 : index
      %c0_30 = arith.constant 0 : index
      %52 = vector.load %arg8[%c0_29, %c0_30] : memref<8x8xf32, #tpu.memory_space<vmem>>, vector<8x8xf32>
      tpu.vector_store %arg8[%c0_29, %c0_30], %51 {strides = array<i32>} : memref<8x8xf32, #tpu.memory_space<vmem>>, vector<8x8xf32>,
    } else {
    }
    return
  }
  func.func @transform_0(%arg0: i32) -> (i32, i32) {
    %c0_i32 = arith.constant 0 : i32
    %c0_i32_0 = arith.constant 0 : i32
    %c0_i32_1 = arith.constant 0 : i32
    return %c0_i32, %c0_i32_0 : i32, i32
  }
  func.func @transform_1(%arg0: i32) -> (i32, i32) {
    %c0_i32 = arith.constant 0 : i32
    %c0_i32_0 = arith.constant 0 : i32
    return %c0_i32, %arg0 : i32, i32
  }
  func.func @transform_2(%arg0: i32) -> (i32, i32) {
    %c0_i32 = arith.constant 0 : i32
    %c0_i32_0 = arith.constant 0 : i32
    return %arg0, %c0_i32 : i32, i32
  }
  func.func @transform_3(%arg0: i32) -> (i32, i32) {
    %c0_i32 = arith.constant 0 : i32
    %c0_i32_0 = arith.constant 0 : i32
    %c0_i32_1 = arith.constant 0 : i32
    return %c0_i32, %c0_i32_0 : i32, i32
  }
  func.func @transform_4(%arg0: i32) -> (i32, i32) {
    %c0_i32 = arith.constant 0 : i32
    %c0_i32_0 = arith.constant 0 : i32
    %c0_i32_1 = arith.constant 0 : i32
    return %c0_i32, %c0_i32_0 : i32, i32
  }
  func.func @transform_5(%arg0: i32) -> (i32, i32) {
    %c0_i32 = arith.constant 0 : i32
    %c0_i32_0 = arith.constant 0 : i32
    %c0_i32_1 = arith.constant 0 : i32
    return %c0_i32, %c0_i32_0 : i32, i32
  }
  func.func @transform_6(%arg0: i32) -> (i32, i32) {
    %c0_i32 = arith.constant 0 : i32
    %c0_i32_0 = arith.constant 0 : i32
    %c0_i32_1 = arith.constant 0 : i32
    return %c0_i32, %c0_i32_0 : i32, i32
  }
  func.func @transform_7(%arg0: i32) -> (i32, i32) {
    %c0_i32 = arith.constant 0 : i32
    %c0_i32_0 = arith.constant 0 : i32
    %c0_i32_1 = arith.constant 0 : i32
    return %c0_i32, %c0_i32_0 : i32, i32
  }
}

</mosaic_0001>

<bundles_post_ra>
// kernel: custom_clip_forward.1
= control target key start
LH: loop header
LB: loop body
LE: loop exit
PB: predicated region body
PF: predicated region fallthrough
CT: control target
= control target key end

     0   :  { %s4603_s0 = inlined_call_operand.<no memory space> [shape: f32[1,1], index: 0, kind: input, shape index: {}]   ;;  %s4604_s1 = inlined_call_operand.vmem [shape: bf16[2,1024], index: 1, kind: input, shape index: {}]   ;;  %s4605_s2 = inlined_call_operand.vmem [shape: bf16[1024,512], index: 2, kind: input, shape index: {}]   ;;  %s4606_s3 = inlined_call_operand.vmem [shape: f32[1,512], index: 3, kind: input, shape index: {}]   ;;  %s4607_s4 = inlined_call_operand.vmem [shape: f32[512,128], index: 4, kind: input, shape index: {}]   ;;  %s4608_s5 = inlined_call_operand.vmem [shape: f32[1,128], index: 5, kind: input, shape index: {}]   ;;  %s4609_s6 = inlined_call_operand.vmem [shape: f32[128,8], index: 6, kind: input, shape index: {}]   ;;  %s4610_s7 = inlined_call_operand.hbm [shape: f32[8,8], index: 7, kind: output, shape index: {}]  }
   0x1   :  { %v12_v0 = vstv %s4603_s0 }
   0x2   :  { %13 = vst [vmem:[#allocation3] sm:$0x1] %v12_v0 }
   0x3   :  { %v2978_v1 = vld [vmem:[%s4605_s2 + $0xe4] ss:$16 sps:$4 sm:$0xff]   ;;  %v2982_v3 = vld [vmem:[%s4605_s2 + $0xe0] ss:$16 sps:$4 sm:$0xff]   ;;  %v3389_v37 = vmov 1966171168   ;;  %v297_v39 = vlaneseq }
   0x4   :  { %v2980_v2 = vld [vmem:[%s4605_s2 + $0x2e4] ss:$16 sps:$4 sm:$0xff]   ;;  %1630 = vmatprep.subr.bf16.mxu0 %v2978_v1  ;;  %v2983_v4 = vld [vmem:[%s4605_s2 + $0x2e0] ss:$16 sps:$4 sm:$0xff]   ;;  %v295_v38 = vunpack.c.l.s4 %v3389_v37 }
   0x5   :  { %1671 = vmatprep.subr.bf16.mxu1 %v2980_v2  ;;  %v2984_v5 = vld [vmem:[%s4605_s2 + $0xc4] ss:$16 sps:$4 sm:$0xff]   ;;  %1631 = vmatpush1.bf16.msra.mxu0 %v2982_v3  ;;  %v2988_v7 = vld [vmem:[%s4605_s2 + $0xc0] ss:$16 sps:$4 sm:$0xff]   ;;  %v3555_v44 = vshrl.u32 %v297_v39, 7 }
   0x6   :  { %1672 = vmatpush1.bf16.msra.mxu1 %v2983_v4  ;;  %v2986_v6 = vld [vmem:[%s4605_s2 + $0x2c4] ss:$16 sps:$4 sm:$0xff]   ;;  %1632 = vmatprep.subr.bf16.mxu0 %v2984_v5  ;;  %v2989_v8 = vld [vmem:[%s4605_s2 + $0x2c0] ss:$16 sps:$4 sm:$0xff]   ;;  %v296_v43 = vunpack.c.0.s8 %v295_v38 }
   0x7   :  { %1673 = vmatprep.subr.bf16.mxu1 %v2986_v6  ;;  %v2990_v9 = vld [vmem:[%s4605_s2 + $0xa4] ss:$16 sps:$4 sm:$0xff]   ;;  %v2994_v11 = vld [vmem:[%s4605_s2 + $0xa0] ss:$16 sps:$4 sm:$0xff]  }
   0x8   :  { %v2992_v10 = vld [vmem:[%s4605_s2 + $0x2a4] ss:$16 sps:$4 sm:$0xff]   ;;  %v2995_v12 = vld [vmem:[%s4605_s2 + $0x2a0] ss:$16 sps:$4 sm:$0xff]   ;;  %v299_v50 = vsub.s32 %v296_v43, %v3555_v44 }
   0x9   :  { %1633 = vmatpush1.bf16.msra.mxu0 %v2988_v7  ;;  %v2996_v13 = vld [vmem:[%s4605_s2 + $0x84] ss:$16 sps:$4 sm:$0xff]   ;;  %v3000_v15 = vld [vmem:[%s4605_s2 + $0x80] ss:$16 sps:$4 sm:$0xff]  }
   0xa   :  { %1674 = vmatpush1.bf16.msra.mxu1 %v2989_v8  ;;  %1634 = vmatprep.subr.bf16.mxu0 %v2990_v9  ;;  %v2998_v14 = vld [vmem:[%s4605_s2 + $0x284] ss:$16 sps:$4 sm:$0xff]   ;;  %v3001_v16 = vld [vmem:[%s4605_s2 + $0x280] ss:$16 sps:$4 sm:$0xff]  }
   0xb   :  { %1675 = vmatprep.subr.bf16.mxu1 %v2992_v10  ;;  %v3002_v17 = vld [vmem:[%s4605_s2 + $0x64] ss:$16 sps:$4 sm:$0xff]   ;;  %v3006_v19 = vld [vmem:[%s4605_s2 + $0x60] ss:$16 sps:$4 sm:$0xff]  }
   0xc   :  { %v3004_v18 = vld [vmem:[%s4605_s2 + $0x264] ss:$16 sps:$4 sm:$0xff]   ;;  %v3007_v20 = vld [vmem:[%s4605_s2 + $0x260] ss:$16 sps:$4 sm:$0xff]  }
   0xd   :  { %1635 = vmatpush1.bf16.msra.mxu0 %v2994_v11  ;;  %v3008_v21 = vld [vmem:[%s4605_s2 + $0x44] ss:$16 sps:$4 sm:$0xff]   ;;  %v3012_v23 = vld [vmem:[%s4605_s2 + $0x40] ss:$16 sps:$4 sm:$0xff]  }
   0xe   :  { %1676 = vmatpush1.bf16.msra.mxu1 %v2995_v12  ;;  %1636 = vmatprep.subr.bf16.mxu0 %v2996_v13  ;;  %v3010_v22 = vld [vmem:[%s4605_s2 + $0x244] ss:$16 sps:$4 sm:$0xff]   ;;  %v3013_v24 = vld [vmem:[%s4605_s2 + $0x240] ss:$16 sps:$4 sm:$0xff]  }
   0xf   :  { %1677 = vmatprep.subr.bf16.mxu1 %v2998_v14  ;;  %v3014_v25 = vld [vmem:[%s4605_s2 + $0x24] ss:$16 sps:$4 sm:$0xff]   ;;  %v3018_v27 = vld [vmem:[%s4605_s2 + $0x20] ss:$16 sps:$4 sm:$0xff]  }
  0x10   :  { %v3016_v26 = vld [vmem:[%s4605_s2 + $0x224] ss:$16 sps:$4 sm:$0xff]   ;;  %v3019_v28 = vld [vmem:[%s4605_s2 + $0x220] ss:$16 sps:$4 sm:$0xff]  }
  0x11   :  { %1637 = vmatpush1.bf16.msra.mxu0 %v3000_v15  ;;  %v3020_v29 = vld [vmem:[%s4605_s2 + $0x4] ss:$16 sps:$4 sm:$0xff]   ;;  %v3024_v31 = vld [vmem:[%s4605_s2] ss:$16 sps:$4 sm:$0xff]  }
  0x12   :  { %1678 = vmatpush1.bf16.msra.mxu1 %v3001_v16  ;;  %1638 = vmatprep.subr.bf16.mxu0 %v3002_v17  ;;  %v3022_v30 = vld [vmem:[%s4605_s2 + $0x204] ss:$16 sps:$4 sm:$0xff]   ;;  %v3025_v32 = vld [vmem:[%s4605_s2 + $0x200] ss:$16 sps:$4 sm:$0xff]  }
  0x13   :  { %1679 = vmatprep.subr.bf16.mxu1 %v3004_v18  ;;  %v3026_v33 = vld [vmem:[%s4605_s2 + $0x1e4] ss:$16 sps:$4 sm:$0xff]   ;;  %v3030_v35 = vld [vmem:[%s4605_s2 + $0x1e0] ss:$16 sps:$4 sm:$0xff]  }
  0x14   :  { %v3028_v34 = vld [vmem:[%s4605_s2 + $0x3e4] ss:$16 sps:$4 sm:$0xff]   ;;  %v3031_v36 = vld [vmem:[%s4605_s2 + $0x3e0] ss:$16 sps:$4 sm:$0xff]  }
  0x15   :  { %1639 = vmatpush1.bf16.msra.mxu0 %v3006_v19  ;;  %v3032_v40 = vld [vmem:[%s4605_s2 + $0x1c4] ss:$16 sps:$4 sm:$0xff]   ;;  %v3036_v42 = vld [vmem:[%s4605_s2 + $0x1c0] ss:$16 sps:$4 sm:$0xff]  }
  0x16   :  { %1680 = vmatpush1.bf16.msra.mxu1 %v3007_v20  ;;  %1640 = vmatprep.subr.bf16.mxu0 %v3008_v21  ;;  %v3034_v41 = vld [vmem:[%s4605_s2 + $0x3c4] ss:$16 sps:$4 sm:$0xff]   ;;  %v3037_v45 = vld [vmem:[%s4605_s2 + $0x3c0] ss:$16 sps:$4 sm:$0xff]  }
  0x17   :  { %1681 = vmatprep.subr.bf16.mxu1 %v3010_v22  ;;  %v3038_v46 = vld [vmem:[%s4605_s2 + $0x1a4] ss:$16 sps:$4 sm:$0xff]   ;;  %v3042_v48 = vld [vmem:[%s4605_s2 + $0x1a0] ss:$16 sps:$4 sm:$0xff]  }
  0x18   :  { %v3040_v47 = vld [vmem:[%s4605_s2 + $0x3a4] ss:$16 sps:$4 sm:$0xff]   ;;  %v3043_v49 = vld [vmem:[%s4605_s2 + $0x3a0] ss:$16 sps:$4 sm:$0xff]  }
  0x19   :  { %1641 = vmatpush1.bf16.msra.mxu0 %v3012_v23  ;;  %v3044_v51 = vld [vmem:[%s4605_s2 + $0x184] ss:$16 sps:$4 sm:$0xff]   ;;  %v3048_v54 = vld [vmem:[%s4605_s2 + $0x180] ss:$16 sps:$4 sm:$0xff]  }
  0x1a   :  { %1682 = vmatpush1.bf16.msra.mxu1 %v3013_v24  ;;  %1642 = vmatprep.subr.bf16.mxu0 %v3014_v25  ;;  %v3046_v52 = vld [vmem:[%s4605_s2 + $0x384] ss:$16 sps:$4 sm:$0xff]   ;;  %v3049_v57 = vld [vmem:[%s4605_s2 + $0x380] ss:$16 sps:$4 sm:$0xff]  }
  0x1b   :  { %1683 = vmatprep.subr.bf16.mxu1 %v3016_v26  ;;  %v35_v53 = vld [vmem:[%s4604_s1] sm:$0xff] }
  0x1c   :  { %v300_v55 = vrot.slane %v35_v53, %v299_v50  ;;  %v293_v56 = vcombine.high %v35_v53, %v35_v53  ;;  %v3050_v58 = vld [vmem:[%s4605_s2 + $0x164] ss:$16 sps:$4 sm:$0xff]   ;;  %v3054_v62 = vld [vmem:[%s4605_s2 + $0x160] ss:$16 sps:$4 sm:$0xff]  }
  0x1d   :  { %1643 = vmatpush1.bf16.msra.mxu0 %v3018_v27  ;;  %v3052_v59 = vld [vmem:[%s4605_s2 + $0x364] ss:$16 sps:$4 sm:$0xff]   ;;  %v3055_v1 = vld [vmem:[%s4605_s2 + $0x360] ss:$16 sps:$4 sm:$0xff]  }
  0x1e   :  { %1684 = vmatpush1.bf16.msra.mxu1 %v3019_v28  ;;  %1644 = vmatprep.subr.bf16.mxu0 %v3020_v29  ;;  %v308_v60 = vcombine.high %v300_v55, %v300_v55  ;;  %v307_v61 = vrot.slane %v293_v56, %v299_v50  ;;  %v3056_v2 = vld [vmem:[%s4605_s2 + $0x144] ss:$16 sps:$4 sm:$0xff]   ;;  %v3060_v5 = vld [vmem:[%s4605_s2 + $0x140] ss:$16 sps:$4 sm:$0xff]   ;;  %v3643_v15 = vrot.slane %v300_v55, %v299_v50 }
  0x1f   :  { %1685 = vmatprep.subr.bf16.mxu1 %v3022_v30  ;;  %v3058_v3 = vld [vmem:[%s4605_s2 + $0x344] ss:$16 sps:$4 sm:$0xff]   ;;  %v3061_v6 = vld [vmem:[%s4605_s2 + $0x340] ss:$16 sps:$4 sm:$0xff]  }
  0x20   :  { %v3597_v63 = vrot.slane %v308_v60, %v299_v50  ;;  %v3599_v0 = vrot.slane %v307_v61, %v299_v50  ;;  %v3062_v7 = vld [vmem:[%s4605_s2 + $0x124] ss:$16 sps:$4 sm:$0xff]   ;;  %v3066_v9 = vld [vmem:[%s4605_s2 + $0x120] ss:$16 sps:$4 sm:$0xff]   ;;  %v309_v13 = vcombine.high %v307_v61, %v307_v61  ;;  %v3658_v20 = vcombine.high %v3643_v15, %v3643_v15 }
  0x21   :  { %1645 = vmatpush1.bf16.msra.mxu0 %v3024_v31  ;;  %v3064_v8 = vld [vmem:[%s4605_s2 + $0x324] ss:$16 sps:$4 sm:$0xff]   ;;  %v3067_v10 = vld [vmem:[%s4605_s2 + $0x320] ss:$16 sps:$4 sm:$0xff]  }
  0x22   :  { %1686 = vmatpush1.bf16.msra.mxu1 %v3025_v32  ;;  %1646 = vmatprep.subr.bf16.mxu0 %v3026_v33  ;;  %v3612_v4 = vcombine.high %v3597_v63, %v3597_v63  ;;  %v3068_v11 = vld [vmem:[%s4605_s2 + $0x104] ss:$16 sps:$4 sm:$0xff]   ;;  %v3072_v14 = vld [vmem:[%s4605_s2 + $0x100] ss:$16 sps:$4 sm:$0xff]   ;;  %v3654_v19 = vrot.slane %v309_v13, %v299_v50 }
  0x23   :  { %1687 = vmatprep.subr.bf16.mxu1 %v3028_v34  ;;  %1662 = vmatprep.mubr.bf16.mxu0 %v3597_v63  ;;  %v3070_v12 = vld [vmem:[%s4605_s2 + $0x304] ss:$16 sps:$4 sm:$0xff]   ;;  %v3073_v16 = vld [vmem:[%s4605_s2 + $0x300] ss:$16 sps:$4 sm:$0xff]  }
  0x24   :  { %1703 = vmatprep.mubr.bf16.mxu1 %v3612_v4  ;;  %v3076_v17 = vld [vmem:[%s4605_s2 + $0x4e4] ss:$16 sps:$4 sm:$0xff]   ;;  %v3074_v21 = vld [vmem:[%s4605_s2 + $0x4e0] ss:$16 sps:$4 sm:$0xff]   ;;  %v3674_v25 = vcombine.high %v3654_v19, %v3654_v19 }
  0x25   :  { %1647 = vmatpush2.bf16.msra.mxu0 %v3030_v35  ;;  %v3079_v18 = vld [vmem:[%s4605_s2 + $0x6e4] ss:$16 sps:$4 sm:$0xff]   ;;  %v3077_v22 = vld [vmem:[%s4605_s2 + $0x6e0] ss:$16 sps:$4 sm:$0xff]  }
  0x26   :  { %1688 = vmatpush2.bf16.msra.mxu1 %v3031_v36  ;;  %1648 = vmatprep.subr.bf16.mxu0 %v3032_v40  ;;  %v3082_v23 = vld [vmem:[%s4605_s2 + $0x4c4] ss:$16 sps:$4 sm:$0xff]   ;;  %v3080_v26 = vld [vmem:[%s4605_s2 + $0x4c0] ss:$16 sps:$4 sm:$0xff]  }
  0x27   :  { %1689 = vmatprep.subr.bf16.mxu1 %v3034_v41  ;;  %v3085_v24 = vld [vmem:[%s4605_s2 + $0x6c4] ss:$16 sps:$4 sm:$0xff]   ;;  %v3083_v27 = vld [vmem:[%s4605_s2 + $0x6c0] ss:$16 sps:$4 sm:$0xff]  }
  0x28   :  { %v3088_v28 = vld [vmem:[%s4605_s2 + $0x4a4] ss:$16 sps:$4 sm:$0xff]   ;;  %v3086_v30 = vld [vmem:[%s4605_s2 + $0x4a0] ss:$16 sps:$4 sm:$0xff]  }
  0x29   :  { %1649 = vmatpush2.bf16.msra.mxu0 %v3036_v42  ;;  %v3091_v29 = vld [vmem:[%s4605_s2 + $0x6a4] ss:$16 sps:$4 sm:$0xff]   ;;  %v3089_v31 = vld [vmem:[%s4605_s2 + $0x6a0] ss:$16 sps:$4 sm:$0xff]  }
  0x2a   :  { %1690 = vmatpush2.bf16.msra.mxu1 %v3037_v45  ;;  %1650 = vmatprep.subr.bf16.mxu0 %v3038_v46  ;;  %v3094_v32 = vld [vmem:[%s4605_s2 + $0x484] ss:$16 sps:$4 sm:$0xff]   ;;  %v3092_v34 = vld [vmem:[%s4605_s2 + $0x480] ss:$16 sps:$4 sm:$0xff]  }
  0x2b   :  { %1691 = vmatprep.subr.bf16.mxu1 %v3040_v47  ;;  %v3097_v33 = vld [vmem:[%s4605_s2 + $0x684] ss:$16 sps:$4 sm:$0xff]   ;;  %v3095_v35 = vld [vmem:[%s4605_s2 + $0x680] ss:$16 sps:$4 sm:$0xff]  }
  0x2c   :  { %v3100_v36 = vld [vmem:[%s4605_s2 + $0x464] ss:$16 sps:$4 sm:$0xff]   ;;  %v3098_v38 = vld [vmem:[%s4605_s2 + $0x460] ss:$16 sps:$4 sm:$0xff]  }
  0x2d   :  { %1651 = vmatpush2.bf16.msra.mxu0 %v3042_v48  ;;  %v3103_v37 = vld [vmem:[%s4605_s2 + $0x664] ss:$16 sps:$4 sm:$0xff]   ;;  %v3101_v39 = vld [vmem:[%s4605_s2 + $0x660] ss:$16 sps:$4 sm:$0xff]  }
  0x2e   :  { %1692 = vmatpush2.bf16.msra.mxu1 %v3043_v49  ;;  %1652 = vmatprep.subr.bf16.mxu0 %v3044_v51  ;;  %v3106_v40 = vld [vmem:[%s4605_s2 + $0x444] ss:$16 sps:$4 sm:$0xff]   ;;  %v3104_v42 = vld [vmem:[%s4605_s2 + $0x440] ss:$16 sps:$4 sm:$0xff]  }
  0x2f   :  { %1693 = vmatprep.subr.bf16.mxu1 %v3046_v52  ;;  %v3109_v41 = vld [vmem:[%s4605_s2 + $0x644] ss:$16 sps:$4 sm:$0xff]   ;;  %v3107_v43 = vld [vmem:[%s4605_s2 + $0x640] ss:$16 sps:$4 sm:$0xff]  }
  0x30   :  { %v3112_v45 = vld [vmem:[%s4605_s2 + $0x424] ss:$16 sps:$4 sm:$0xff]   ;;  %v3110_v47 = vld [vmem:[%s4605_s2 + $0x420] ss:$16 sps:$4 sm:$0xff]  }
  0x31   :  { %1653 = vmatpush2.bf16.msra.mxu0 %v3048_v54  ;;  %v3115_v46 = vld [vmem:[%s4605_s2 + $0x624] ss:$16 sps:$4 sm:$0xff]   ;;  %v3113_v48 = vld [vmem:[%s4605_s2 + $0x620] ss:$16 sps:$4 sm:$0xff]  }
  0x32   :  { %1694 = vmatpush2.bf16.msra.mxu1 %v3049_v57  ;;  %1654 = vmatprep.subr.bf16.mxu0 %v3050_v58  ;;  %v3118_v49 = vld [vmem:[%s4605_s2 + $0x404] ss:$16 sps:$4 sm:$0xff]   ;;  %v3116_v51 = vld [vmem:[%s4605_s2 + $0x400] ss:$16 sps:$4 sm:$0xff]  }
  0x33   :  { %1695 = vmatprep.subr.bf16.mxu1 %v3052_v59  ;;  %v3121_v50 = vld [vmem:[%s4605_s2 + $0x604] ss:$16 sps:$4 sm:$0xff]   ;;  %v3119_v52 = vld [vmem:[%s4605_s2 + $0x600] ss:$16 sps:$4 sm:$0xff]  }
  0x34   :  { %v3124_v53 = vld [vmem:[%s4605_s2 + $0x5e4] ss:$16 sps:$4 sm:$0xff]   ;;  %v3122_v55 = vld [vmem:[%s4605_s2 + $0x5e0] ss:$16 sps:$4 sm:$0xff]  }
  0x35   :  { %1655 = vmatpush2.bf16.msra.mxu0 %v3054_v62  ;;  %v3127_v54 = vld [vmem:[%s4605_s2 + $0x7e4] ss:$16 sps:$4 sm:$0xff]   ;;  %v3125_v56 = vld [vmem:[%s4605_s2 + $0x7e0] ss:$16 sps:$4 sm:$0xff]  }
  0x36   :  { %1696 = vmatpush2.bf16.msra.mxu1 %v3055_v1  ;;  %1656 = vmatprep.subr.bf16.mxu0 %v3056_v2  ;;  %v3130_v57 = vld [vmem:[%s4605_s2 + $0x5c4] ss:$16 sps:$4 sm:$0xff]   ;;  %v3128_v59 = vld [vmem:[%s4605_s2 + $0x5c0] ss:$16 sps:$4 sm:$0xff]  }
  0x37   :  { %1697 = vmatprep.subr.bf16.mxu1 %v3058_v3  ;;  %v3133_v58 = vld [vmem:[%s4605_s2 + $0x7c4] ss:$16 sps:$4 sm:$0xff]   ;;  %v3131_v60 = vld [vmem:[%s4605_s2 + $0x7c0] ss:$16 sps:$4 sm:$0xff]  }
  0x38   :  { %v3136_v61 = vld [vmem:[%s4605_s2 + $0x5a4] ss:$16 sps:$4 sm:$0xff]   ;;  %v3134_v1 = vld [vmem:[%s4605_s2 + $0x5a0] ss:$16 sps:$4 sm:$0xff]  }
  0x39   :  { %1657 = vmatpush2.bf16.msra.mxu0 %v3060_v5  ;;  %v3139_v62 = vld [vmem:[%s4605_s2 + $0x7a4] ss:$16 sps:$4 sm:$0xff]   ;;  %v3137_v2 = vld [vmem:[%s4605_s2 + $0x7a0] ss:$16 sps:$4 sm:$0xff]  }
  0x3a   :  { %1698 = vmatpush2.bf16.msra.mxu1 %v3061_v6  ;;  %1658 = vmatprep.subr.bf16.mxu0 %v3062_v7  ;;  %v3142_v3 = vld [vmem:[%s4605_s2 + $0x584] ss:$16 sps:$4 sm:$0xff]   ;;  %v3140_v6 = vld [vmem:[%s4605_s2 + $0x580] ss:$16 sps:$4 sm:$0xff]  }
  0x3b   :  { %1699 = vmatprep.subr.bf16.mxu1 %v3064_v8  ;;  %v3145_v5 = vld [vmem:[%s4605_s2 + $0x784] ss:$16 sps:$4 sm:$0xff]   ;;  %v3143_v7 = vld [vmem:[%s4605_s2 + $0x780] ss:$16 sps:$4 sm:$0xff]  }
  0x3c   :  { %v3148_v8 = vld [vmem:[%s4605_s2 + $0x564] ss:$16 sps:$4 sm:$0xff]  }
  0x3d   :  { %1659 = vmatpush2.bf16.msra.mxu0 %v3066_v9  ;;  %v3151_v9 = vld [vmem:[%s4605_s2 + $0x764] ss:$16 sps:$4 sm:$0xff]  }
  0x3e   :  { %1700 = vmatpush2.bf16.msra.mxu1 %v3067_v10  ;;  %1660 = vmatprep.subr.bf16.mxu0 %v3068_v11  ;;  %v3146_v10 = vld [vmem:[%s4605_s2 + $0x560] ss:$16 sps:$4 sm:$0xff]   ;;  %v3157_v13 = vld [vmem:[%s4605_s2 + $0x744] ss:$16 sps:$4 sm:$0xff]  }
  0x3f   :  { %1701 = vmatprep.subr.bf16.mxu1 %v3070_v12  ;;  %v3149_v11 = vld [vmem:[%s4605_s2 + $0x760] ss:$16 sps:$4 sm:$0xff]   ;;  %v3154_v12 = vld [vmem:[%s4605_s2 + $0x544] ss:$16 sps:$4 sm:$0xff]  }
  0x41   :  { %1661 = vmatpush2.bf16.msra.mxu0 %v3072_v14  ;;  %v3152_v14 = vld [vmem:[%s4605_s2 + $0x540] ss:$16 sps:$4 sm:$0xff]  }
  0x42   :  { %1702 = vmatpush2.bf16.msra.mxu1 %v3073_v16  ;;  %1712 = vmatprep.subr.bf16.mxu0 %v3076_v17  ;;  %v3155_v16 = vld [vmem:[%s4605_s2 + $0x740] ss:$16 sps:$4 sm:$0xff]   ;;  %v3160_v17 = vld [vmem:[%s4605_s2 + $0x524] ss:$16 sps:$4 sm:$0xff]  }
  0x43   :  { %1753 = vmatprep.subr.bf16.mxu1 %v3079_v18  ;;  %v3163_v18 = vld [vmem:[%s4605_s2 + $0x724] ss:$16 sps:$4 sm:$0xff]  }
  0x44   :  { %1663 = vmatmul.mubr.bf16.vlgmr.msra.gmra.mxu0 %v3643_v15 }
  0x45   :  { %1704 = vmatmul.mubr.bf16.vlgmr.msra.gmra.mxu1 %v3658_v20  ;;  %1713 = vmatpush1.bf16.msra.mxu0 %v3074_v21  ;;  %v3158_v21 = vld [vmem:[%s4605_s2 + $0x520] ss:$16 sps:$4 sm:$0xff]  }
  0x46   :  { %1754 = vmatpush1.bf16.msra.mxu1 %v3077_v22  ;;  %1714 = vmatprep.subr.bf16.mxu0 %v3082_v23  ;;  %v3161_v22 = vld [vmem:[%s4605_s2 + $0x720] ss:$16 sps:$4 sm:$0xff]   ;;  %v3166_v23 = vld [vmem:[%s4605_s2 + $0x504] ss:$16 sps:$4 sm:$0xff]  }
  0x47   :  { %1755 = vmatprep.subr.bf16.mxu1 %v3085_v24  ;;  %1744 = vmatprep.mubr.bf16.mxu0 %v3654_v19  ;;  %v3169_v24 = vld [vmem:[%s4605_s2 + $0x704] ss:$16 sps:$4 sm:$0xff]  }
  0x48   :  { %1785 = vmatprep.mubr.bf16.mxu1 %v3674_v25 }
  0x49   :  { %1715 = vmatpush1.bf16.msra.mxu0 %v3080_v26  ;;  %v3164_v26 = vld [vmem:[%s4605_s2 + $0x500] ss:$16 sps:$4 sm:$0xff]  }
  0x4a   :  { %1756 = vmatpush1.bf16.msra.mxu1 %v3083_v27  ;;  %1716 = vmatprep.subr.bf16.mxu0 %v3088_v28  ;;  %v3167_v27 = vld [vmem:[%s4605_s2 + $0x700] ss:$16 sps:$4 sm:$0xff]   ;;  %v3173_v28 = vld [vmem:[%s4605_s2 + $0xec] ss:$16 sps:$4 sm:$0xff]  }
  0x4b   :  { %1757 = vmatprep.subr.bf16.mxu1 %v3091_v29  ;;  %v3176_v29 = vld [vmem:[%s4605_s2 + $0x2ec] ss:$16 sps:$4 sm:$0xff]  }
  0x4d   :  { %1717 = vmatpush1.bf16.msra.mxu0 %v3086_v30  ;;  %v3862_v30 = vcombine.high %v3599_v0, %v3599_v0 }
  0x4e   :  { %1758 = vmatpush1.bf16.msra.mxu1 %v3089_v31  ;;  %1718 = vmatprep.subr.bf16.mxu0 %v3094_v32  ;;  %v3171_v31 = vld [vmem:[%s4605_s2 + $0xe8] ss:$16 sps:$4 sm:$0xff]  }
  0x4f   :  { %1759 = vmatprep.subr.bf16.mxu1 %v3097_v33  ;;  %v3174_v32 = vld [vmem:[%s4605_s2 + $0x2e8] ss:$16 sps:$4 sm:$0xff]   ;;  %v3179_v33 = vld [vmem:[%s4605_s2 + $0xcc] ss:$16 sps:$4 sm:$0xff]  }
  0x51   :  { %1719 = vmatpush1.bf16.msra.mxu0 %v3092_v34  ;;  %v3182_v34 = vld [vmem:[%s4605_s2 + $0x2cc] ss:$16 sps:$4 sm:$0xff]  }
  0x52   :  { %1760 = vmatpush1.bf16.msra.mxu1 %v3095_v35  ;;  %1720 = vmatprep.subr.bf16.mxu0 %v3100_v36  ;;  %v3177_v35 = vld [vmem:[%s4605_s2 + $0xc8] ss:$16 sps:$4 sm:$0xff]  }
  0x53   :  { %1761 = vmatprep.subr.bf16.mxu1 %v3103_v37  ;;  %v3180_v36 = vld [vmem:[%s4605_s2 + $0x2c8] ss:$16 sps:$4 sm:$0xff]   ;;  %v3185_v37 = vld [vmem:[%s4605_s2 + $0xac] ss:$16 sps:$4 sm:$0xff]  }
  0x55   :  { %1721 = vmatpush1.bf16.msra.mxu0 %v3098_v38  ;;  %v3188_v38 = vld [vmem:[%s4605_s2 + $0x2ac] ss:$16 sps:$4 sm:$0xff]  }
  0x56   :  { %1762 = vmatpush1.bf16.msra.mxu1 %v3101_v39  ;;  %1722 = vmatprep.subr.bf16.mxu0 %v3106_v40  ;;  %v3183_v39 = vld [vmem:[%s4605_s2 + $0xa8] ss:$16 sps:$4 sm:$0xff]  }
  0x57   :  { %1763 = vmatprep.subr.bf16.mxu1 %v3109_v41  ;;  %v3186_v40 = vld [vmem:[%s4605_s2 + $0x2a8] ss:$16 sps:$4 sm:$0xff]   ;;  %v3191_v41 = vld [vmem:[%s4605_s2 + $0x8c] ss:$16 sps:$4 sm:$0xff]  }
  0x59   :  { %1723 = vmatpush1.bf16.msra.mxu0 %v3104_v42  ;;  %v3192_v42 = vld [vmem:[%s4605_s2 + $0x288] ss:$16 sps:$4 sm:$0xff]  }
  0x5a   :  { %1764 = vmatpush1.bf16.msra.mxu1 %v3107_v43  ;;  %1724 = vmatprep.subr.bf16.mxu0 %v3112_v45  ;;  %v3197_v43 = vld [vmem:[%s4605_s2 + $0x6c] ss:$16 sps:$4 sm:$0xff]  }
  0x5b   :  { %1765 = vmatprep.subr.bf16.mxu1 %v3115_v46  ;;  %v3200_v45 = vld [vmem:[%s4605_s2 + $0x26c] ss:$16 sps:$4 sm:$0xff]   ;;  %v3195_v46 = vld [vmem:[%s4605_s2 + $0x68] ss:$16 sps:$4 sm:$0xff]  }
  0x5d   :  { %1725 = vmatpush1.bf16.msra.mxu0 %v3110_v47  ;;  %v3198_v47 = vld [vmem:[%s4605_s2 + $0x268] ss:$16 sps:$4 sm:$0xff]  }
  0x5e   :  { %1766 = vmatpush1.bf16.msra.mxu1 %v3113_v48  ;;  %1726 = vmatprep.subr.bf16.mxu0 %v3118_v49  ;;  %v3203_v48 = vld [vmem:[%s4605_s2 + $0x4c] ss:$16 sps:$4 sm:$0xff]  }
  0x5f   :  { %1767 = vmatprep.subr.bf16.mxu1 %v3121_v50  ;;  %v3206_v49 = vld [vmem:[%s4605_s2 + $0x24c] ss:$16 sps:$4 sm:$0xff]   ;;  %v3201_v50 = vld [vmem:[%s4605_s2 + $0x48] ss:$16 sps:$4 sm:$0xff]  }
  0x61   :  { %1727 = vmatpush1.bf16.msra.mxu0 %v3116_v51  ;;  %v3204_v51 = vld [vmem:[%s4605_s2 + $0x248] ss:$16 sps:$4 sm:$0xff]  }
  0x62   :  { %1768 = vmatpush1.bf16.msra.mxu1 %v3119_v52  ;;  %1728 = vmatprep.subr.bf16.mxu0 %v3124_v53  ;;  %v3209_v52 = vld [vmem:[%s4605_s2 + $0x2c] ss:$16 sps:$4 sm:$0xff]  }
  0x63   :  { %1769 = vmatprep.subr.bf16.mxu1 %v3127_v54  ;;  %v3212_v53 = vld [vmem:[%s4605_s2 + $0x22c] ss:$16 sps:$4 sm:$0xff]   ;;  %v3207_v54 = vld [vmem:[%s4605_s2 + $0x28] ss:$16 sps:$4 sm:$0xff]  }
  0x65   :  { %1729 = vmatpush2.bf16.msra.mxu0 %v3122_v55  ;;  %v3210_v55 = vld [vmem:[%s4605_s2 + $0x228] ss:$16 sps:$4 sm:$0xff]  }
  0x66   :  { %1770 = vmatpush2.bf16.msra.mxu1 %v3125_v56  ;;  %1730 = vmatprep.subr.bf16.mxu0 %v3130_v57  ;;  %v3215_v56 = vld [vmem:[%s4605_s2 + $0xc] ss:$16 sps:$4 sm:$0xff]  }
  0x67   :  { %1771 = vmatprep.subr.bf16.mxu1 %v3133_v58  ;;  %v3218_v57 = vld [vmem:[%s4605_s2 + $0x20c] ss:$16 sps:$4 sm:$0xff]   ;;  %v3213_v58 = vld [vmem:[%s4605_s2 + $0x8] ss:$16 sps:$4 sm:$0xff]  }
  0x69   :  { %1731 = vmatpush2.bf16.msra.mxu0 %v3128_v59  ;;  %v3216_v59 = vld [vmem:[%s4605_s2 + $0x208] ss:$16 sps:$4 sm:$0xff]  }
  0x6a   :  { %1772 = vmatpush2.bf16.msra.mxu1 %v3131_v60  ;;  %1732 = vmatprep.subr.bf16.mxu0 %v3136_v61  ;;  %v3221_v60 = vld [vmem:[%s4605_s2 + $0x1ec] ss:$16 sps:$4 sm:$0xff]  }
  0x6b   :  { %1773 = vmatprep.subr.bf16.mxu1 %v3139_v62  ;;  %v3224_v61 = vld [vmem:[%s4605_s2 + $0x3ec] ss:$16 sps:$4 sm:$0xff]   ;;  %v3219_v62 = vld [vmem:[%s4605_s2 + $0x1e8] ss:$16 sps:$4 sm:$0xff]  }
  0x6d   :  { %1733 = vmatpush2.bf16.msra.mxu0 %v3134_v1  ;;  %v3222_v1 = vld [vmem:[%s4605_s2 + $0x3e8] ss:$16 sps:$4 sm:$0xff]  }
  0x6e   :  { %1774 = vmatpush2.bf16.msra.mxu1 %v3137_v2  ;;  %1734 = vmatprep.subr.bf16.mxu0 %v3142_v3  ;;  %v3227_v2 = vld [vmem:[%s4605_s2 + $0x1cc] ss:$16 sps:$4 sm:$0xff]  }
  0x6f   :  { %1775 = vmatprep.subr.bf16.mxu1 %v3145_v5  ;;  %v3230_v3 = vld [vmem:[%s4605_s2 + $0x3cc] ss:$16 sps:$4 sm:$0xff]   ;;  %v3225_v5 = vld [vmem:[%s4605_s2 + $0x1c8] ss:$16 sps:$4 sm:$0xff]  }
  0x71   :  { %1735 = vmatpush2.bf16.msra.mxu0 %v3140_v6  ;;  %v3228_v6 = vld [vmem:[%s4605_s2 + $0x3c8] ss:$16 sps:$4 sm:$0xff]  }
  0x72   :  { %1776 = vmatpush2.bf16.msra.mxu1 %v3143_v7  ;;  %1736 = vmatprep.subr.bf16.mxu0 %v3148_v8  ;;  %v3233_v7 = vld [vmem:[%s4605_s2 + $0x1ac] ss:$16 sps:$4 sm:$0xff]  }
  0x73   :  { %1777 = vmatprep.subr.bf16.mxu1 %v3151_v9  ;;  %v3236_v8 = vld [vmem:[%s4605_s2 + $0x3ac] ss:$16 sps:$4 sm:$0xff]   ;;  %v3231_v9 = vld [vmem:[%s4605_s2 + $0x1a8] ss:$16 sps:$4 sm:$0xff]  }
  0x75   :  { %1737 = vmatpush2.bf16.msra.mxu0 %v3146_v10  ;;  %v3234_v10 = vld [vmem:[%s4605_s2 + $0x3a8] ss:$16 sps:$4 sm:$0xff]  }
  0x76   :  { %1778 = vmatpush2.bf16.msra.mxu1 %v3149_v11  ;;  %1738 = vmatprep.subr.bf16.mxu0 %v3154_v12  ;;  %v3239_v11 = vld [vmem:[%s4605_s2 + $0x18c] ss:$16 sps:$4 sm:$0xff]  }
  0x77   :  { %1779 = vmatprep.subr.bf16.mxu1 %v3157_v13  ;;  %v3242_v12 = vld [vmem:[%s4605_s2 + $0x38c] ss:$16 sps:$4 sm:$0xff]  }
  0x79   :  { %1739 = vmatpush2.bf16.msra.mxu0 %v3152_v14 }
  0x7a   :  { %1780 = vmatpush2.bf16.msra.mxu1 %v3155_v16  ;;  %1740 = vmatprep.subr.bf16.mxu0 %v3160_v17 }
  0x7b   :  { %1781 = vmatprep.subr.bf16.mxu1 %v3163_v18 }
  0x7d   :  { %1741 = vmatpush2.bf16.msra.mxu0 %v3158_v21 }
  0x7e   :  { %1782 = vmatpush2.bf16.msra.mxu1 %v3161_v22  ;;  %1742 = vmatprep.subr.bf16.mxu0 %v3166_v23 }
  0x7f   :  { %1783 = vmatprep.subr.bf16.mxu1 %v3169_v24 }
  0x81   :  { %1743 = vmatpush2.bf16.msra.mxu0 %v3164_v26 }
  0x82   :  { %1784 = vmatpush2.bf16.msra.mxu1 %v3167_v27  ;;  %1794 = vmatprep.subr.bf16.mxu0 %v3173_v28 }
  0x83   :  { %1835 = vmatprep.subr.bf16.mxu1 %v3176_v29 }
  0x84   :  { %1745 = vmatmul.mubr.bf16.vlgmr.msra.gmra.mxu0 %v3599_v0 }
  0x85   :  { %1786 = vmatmul.mubr.bf16.vlgmr.msra.gmra.mxu1 %v3862_v30  ;;  %1795 = vmatpush1.bf16.msra.mxu0 %v3171_v31 }
  0x86   :  { %1836 = vmatpush1.bf16.msra.mxu1 %v3174_v32  ;;  %1796 = vmatprep.subr.bf16.mxu0 %v3179_v33 }
  0x87   :  { %1837 = vmatprep.subr.bf16.mxu1 %v3182_v34  ;;  %1826 = vmatprep.mubr.bf16.mxu0 %v3597_v63  ;;  %v3194_v63 = vld [vmem:[%s4605_s2 + $0x28c] ss:$16 sps:$4 sm:$0xff]  }
  0x88   :  { %1867 = vmatprep.mubr.bf16.mxu1 %v3612_v4  ;;  %v3189_v4 = vld [vmem:[%s4605_s2 + $0x88] ss:$16 sps:$4 sm:$0xff]  }
  0x89   :  { %1797 = vmatpush1.bf16.msra.mxu0 %v3177_v35 }
  0x8a   :  { %1838 = vmatpush1.bf16.msra.mxu1 %v3180_v36  ;;  %1798 = vmatprep.subr.bf16.mxu0 %v3185_v37 }
  0x8b   :  { %1839 = vmatprep.subr.bf16.mxu1 %v3188_v38 }
  0x8d   :  { %1799 = vmatpush1.bf16.msra.mxu0 %v3183_v39 }
  0x8e   :  { %1840 = vmatpush1.bf16.msra.mxu1 %v3186_v40  ;;  %1800 = vmatprep.subr.bf16.mxu0 %v3191_v41 }
  0x8f   :  { %1841 = vmatprep.subr.bf16.mxu1 %v3194_v63 }
  0x91   :  { %1801 = vmatpush1.bf16.msra.mxu0 %v3189_v4 }
  0x92   :  { %1842 = vmatpush1.bf16.msra.mxu1 %v3192_v42  ;;  %1802 = vmatprep.subr.bf16.mxu0 %v3197_v43 }
  0x93   :  { %1843 = vmatprep.subr.bf16.mxu1 %v3200_v45 }
  0x95   :  { %1803 = vmatpush1.bf16.msra.mxu0 %v3195_v46 }
  0x96   :  { %1844 = vmatpush1.bf16.msra.mxu1 %v3198_v47  ;;  %1804 = vmatprep.subr.bf16.mxu0 %v3203_v48 }
  0x97   :  { %1845 = vmatprep.subr.bf16.mxu1 %v3206_v49 }
  0x99   :  { %1805 = vmatpush1.bf16.msra.mxu0 %v3201_v50 }
  0x9a   :  { %1846 = vmatpush1.bf16.msra.mxu1 %v3204_v51  ;;  %1806 = vmatprep.subr.bf16.mxu0 %v3209_v52 }
  0x9b   :  { %1847 = vmatprep.subr.bf16.mxu1 %v3212_v53 }
  0x9d   :  { %1807 = vmatpush1.bf16.msra.mxu0 %v3207_v54 }
  0x9e   :  { %1848 = vmatpush1.bf16.msra.mxu1 %v3210_v55  ;;  %1808 = vmatprep.subr.bf16.mxu0 %v3215_v56 }
  0x9f   :  { %1849 = vmatprep.subr.bf16.mxu1 %v3218_v57 }
  0xa1   :  { %1809 = vmatpush1.bf16.msra.mxu0 %v3213_v58 }
  0xa2   :  { %1850 = vmatpush1.bf16.msra.mxu1 %v3216_v59  ;;  %1810 = vmatprep.subr.bf16.mxu0 %v3221_v60 }
  0xa3   :  { %1851 = vmatprep.subr.bf16.mxu1 %v3224_v61 }
  0xa5   :  { %1811 = vmatpush2.bf16.msra.mxu0 %v3219_v62 }
  0xa6   :  { %1852 = vmatpush2.bf16.msra.mxu1 %v3222_v1  ;;  %1812 = vmatprep.subr.bf16.mxu0 %v3227_v2 }
  0xa7   :  { %1853 = vmatprep.subr.bf16.mxu1 %v3230_v3 }
  0xa9   :  { %1813 = vmatpush2.bf16.msra.mxu0 %v3225_v5 }
  0xaa   :  { %1854 = vmatpush2.bf16.msra.mxu1 %v3228_v6  ;;  %1814 = vmatprep.subr.bf16.mxu0 %v3233_v7 }
  0xab   :  { %1855 = vmatprep.subr.bf16.mxu1 %v3236_v8 }
  0xac   :  { %14 = vsyncpa [#allocation5], 0  ;;  %v3237_v13 = vld [vmem:[%s4605_s2 + $0x188] ss:$16 sps:$4 sm:$0xff]   ;;  %v3245_v16 = vld [vmem:[%s4605_s2 + $0x16c] ss:$16 sps:$4 sm:$0xff]  }
  0xad   :  { %1815 = vmatpush2.bf16.msra.mxu0 %v3231_v9  ;;  %v3240_v14 = vld [vmem:[%s4605_s2 + $0x388] ss:$16 sps:$4 sm:$0xff]   ;;  %v3248_v17 = vld [vmem:[%s4605_s2 + $0x36c] ss:$16 sps:$4 sm:$0xff]   ;;  %vm2295_vm0 = vcmask 64512   ;;  %vm2273_vm1 = vcmask 1041408  }
  0xae   :  { %1856 = vmatpush2.bf16.msra.mxu1 %v3234_v10  ;;  %1816 = vmatprep.subr.bf16.mxu0 %v3239_v11  ;;  %v3243_v18 = vld [vmem:[%s4605_s2 + $0x168] ss:$16 sps:$4 sm:$0xff]   ;;  %v3251_v22 = vld [vmem:[%s4605_s2 + $0x14c] ss:$16 sps:$4 sm:$0xff]   ;;  %vm3392_vm2 = vmmov 0   ;;  %vm2422_vm3 = vcmask 58368  }
  0xaf   :  { %1857 = vmatprep.subr.bf16.mxu1 %v3242_v12  ;;  %v3246_v21 = vld [vmem:[%s4605_s2 + $0x368] ss:$16 sps:$4 sm:$0xff]   ;;  %v3254_v23 = vld [vmem:[%s4605_s2 + $0x34c] ss:$16 sps:$4 sm:$0xff]   ;;  %vm2477_vm9 = vcmask 15360  }
  0xb0   :  { %v3249_v24 = vld [vmem:[%s4605_s2 + $0x148] ss:$16 sps:$4 sm:$0xff]   ;;  %v3257_v27 = vld [vmem:[%s4605_s2 + $0x12c] ss:$16 sps:$4 sm:$0xff]  }
  0xb1   :  { %1817 = vmatpush2.bf16.msra.mxu0 %v3237_v13  ;;  %v3252_v26 = vld [vmem:[%s4605_s2 + $0x348] ss:$16 sps:$4 sm:$0xff]   ;;  %v3260_v28 = vld [vmem:[%s4605_s2 + $0x32c] ss:$16 sps:$4 sm:$0xff]  }
  0xb2   :  { %1858 = vmatpush2.bf16.msra.mxu1 %v3240_v14  ;;  %1818 = vmatprep.subr.bf16.mxu0 %v3245_v16  ;;  %v3255_v29 = vld [vmem:[%s4605_s2 + $0x128] ss:$16 sps:$4 sm:$0xff]   ;;  %v3263_v32 = vld [vmem:[%s4605_s2 + $0x10c] ss:$16 sps:$4 sm:$0xff]  }
  0xb3   :  { %1859 = vmatprep.subr.bf16.mxu1 %v3248_v17  ;;  %v3258_v31 = vld [vmem:[%s4605_s2 + $0x328] ss:$16 sps:$4 sm:$0xff]   ;;  %v3266_v33 = vld [vmem:[%s4605_s2 + $0x30c] ss:$16 sps:$4 sm:$0xff]  }
  0xb4   :  { %v3261_v34 = vld [vmem:[%s4605_s2 + $0x108] ss:$16 sps:$4 sm:$0xff]   ;;  %v3269_v36 = vld [vmem:[%s4605_s2 + $0x4ec] ss:$16 sps:$4 sm:$0xff]  }
  0xb5   :  { %1819 = vmatpush2.bf16.msra.mxu0 %v3243_v18  ;;  %v3264_v35 = vld [vmem:[%s4605_s2 + $0x308] ss:$16 sps:$4 sm:$0xff]   ;;  %v3272_v37 = vld [vmem:[%s4605_s2 + $0x6ec] ss:$16 sps:$4 sm:$0xff]  }
  0xb6   :  { %1860 = vmatpush2.bf16.msra.mxu1 %v3246_v21  ;;  %1820 = vmatprep.subr.bf16.mxu0 %v3251_v22  ;;  %v3267_v38 = vld [vmem:[%s4605_s2 + $0x4e8] ss:$16 sps:$4 sm:$0xff]   ;;  %v3275_v40 = vld [vmem:[%s4605_s2 + $0x4cc] ss:$16 sps:$4 sm:$0xff]  }
  0xb7   :  { %1861 = vmatprep.subr.bf16.mxu1 %v3254_v23  ;;  %v3270_v39 = vld [vmem:[%s4605_s2 + $0x6e8] ss:$16 sps:$4 sm:$0xff]   ;;  %v3278_v41 = vld [vmem:[%s4605_s2 + $0x6cc] ss:$16 sps:$4 sm:$0xff]  }
  0xb8   :  { %v3273_v63 = vld [vmem:[%s4605_s2 + $0x4c8] ss:$16 sps:$4 sm:$0xff]   ;;  %v3281_v42 = vld [vmem:[%s4605_s2 + $0x4ac] ss:$16 sps:$4 sm:$0xff]  }
  0xb9   :  { %1821 = vmatpush2.bf16.msra.mxu0 %v3249_v24  ;;  %v3276_v4 = vld [vmem:[%s4605_s2 + $0x6c8] ss:$16 sps:$4 sm:$0xff]   ;;  %v3287_v45 = vld [vmem:[%s4605_s2 + $0x48c] ss:$16 sps:$4 sm:$0xff]  }
  0xba   :  { %1862 = vmatpush2.bf16.msra.mxu1 %v3252_v26  ;;  %1822 = vmatprep.subr.bf16.mxu0 %v3257_v27  ;;  %v3282_v43 = vld [vmem:[%s4605_s2 + $0x6a8] ss:$16 sps:$4 sm:$0xff]   ;;  %v3293_v47 = vld [vmem:[%s4605_s2 + $0x46c] ss:$16 sps:$4 sm:$0xff]  }
  0xbb   :  { %1863 = vmatprep.subr.bf16.mxu1 %v3260_v28  ;;  %v3288_v46 = vld [vmem:[%s4605_s2 + $0x688] ss:$16 sps:$4 sm:$0xff]   ;;  %v3296_v48 = vld [vmem:[%s4605_s2 + $0x66c] ss:$16 sps:$4 sm:$0xff]  }
  0xbc   :  { %v3291_v49 = vld [vmem:[%s4605_s2 + $0x468] ss:$16 sps:$4 sm:$0xff]   ;;  %v3299_v51 = vld [vmem:[%s4605_s2 + $0x44c] ss:$16 sps:$4 sm:$0xff]  }
  0xbd   :  { %1823 = vmatpush2.bf16.msra.mxu0 %v3255_v29  ;;  %v3294_v50 = vld [vmem:[%s4605_s2 + $0x668] ss:$16 sps:$4 sm:$0xff]   ;;  %v3302_v52 = vld [vmem:[%s4605_s2 + $0x64c] ss:$16 sps:$4 sm:$0xff]  }
  0xbe   :  { %1864 = vmatpush2.bf16.msra.mxu1 %v3258_v31  ;;  %1824 = vmatprep.subr.bf16.mxu0 %v3263_v32  ;;  %v3297_v53 = vld [vmem:[%s4605_s2 + $0x448] ss:$16 sps:$4 sm:$0xff]   ;;  %v3305_v55 = vld [vmem:[%s4605_s2 + $0x42c] ss:$16 sps:$4 sm:$0xff]  }
  0xbf   :  { %1865 = vmatprep.subr.bf16.mxu1 %v3266_v33  ;;  %v3300_v54 = vld [vmem:[%s4605_s2 + $0x648] ss:$16 sps:$4 sm:$0xff]   ;;  %v3308_v56 = vld [vmem:[%s4605_s2 + $0x62c] ss:$16 sps:$4 sm:$0xff]  }
  0xc0   :  { %v3303_v57 = vld [vmem:[%s4605_s2 + $0x428] ss:$16 sps:$4 sm:$0xff]   ;;  %v3311_v59 = vld [vmem:[%s4605_s2 + $0x40c] ss:$16 sps:$4 sm:$0xff]  }
  0xc1   :  { %1825 = vmatpush2.bf16.msra.mxu0 %v3261_v34  ;;  %v3306_v58 = vld [vmem:[%s4605_s2 + $0x628] ss:$16 sps:$4 sm:$0xff]   ;;  %v3314_v60 = vld [vmem:[%s4605_s2 + $0x60c] ss:$16 sps:$4 sm:$0xff]  }
  0xc2   :  { %1866 = vmatpush2.bf16.msra.mxu1 %v3264_v35  ;;  %1876 = vmatprep.subr.bf16.mxu0 %v3269_v36  ;;  %v3309_v61 = vld [vmem:[%s4605_s2 + $0x408] ss:$16 sps:$4 sm:$0xff]   ;;  %v3317_v1 = vld [vmem:[%s4605_s2 + $0x5ec] ss:$16 sps:$4 sm:$0xff]  }
  0xc3   :  { %1917 = vmatprep.subr.bf16.mxu1 %v3272_v37  ;;  %v3312_v62 = vld [vmem:[%s4605_s2 + $0x608] ss:$16 sps:$4 sm:$0xff]   ;;  %v3320_v2 = vld [vmem:[%s4605_s2 + $0x7ec] ss:$16 sps:$4 sm:$0xff]  }
  0xc4   :  { %1827 = vmatmul.mubr.bf16.vlgmr.msra.gmra.mxu0 %v3643_v15  ;;  %v3284_v15 = vld [vmem:[%s4605_s2 + $0x6ac] ss:$16 sps:$4 sm:$0xff]   ;;  %v3315_v3 = vld [vmem:[%s4605_s2 + $0x5e8] ss:$16 sps:$4 sm:$0xff]  }
  0xc5   :  { %1868 = vmatmul.mubr.bf16.vlgmr.msra.gmra.mxu1 %v3658_v20  ;;  %1877 = vmatpush1.bf16.msra.mxu0 %v3267_v38  ;;  %v3279_v20 = vld [vmem:[%s4605_s2 + $0x4a8] ss:$16 sps:$4 sm:$0xff]   ;;  %v3323_v6 = vld [vmem:[%s4605_s2 + $0x5cc] ss:$16 sps:$4 sm:$0xff]  }
  0xc6   :  { %1918 = vmatpush1.bf16.msra.mxu1 %v3270_v39  ;;  %1878 = vmatprep.subr.bf16.mxu0 %v3275_v40  ;;  %v3318_v5 = vld [vmem:[%s4605_s2 + $0x7e8] ss:$16 sps:$4 sm:$0xff]   ;;  %v3326_v7 = vld [vmem:[%s4605_s2 + $0x7cc] ss:$16 sps:$4 sm:$0xff]  }
  0xc7   :  { %1919 = vmatprep.subr.bf16.mxu1 %v3278_v41  ;;  %1908 = vmatprep.mubr.bf16.mxu0 %v3654_v19  ;;  %v3290_v19 = vld [vmem:[%s4605_s2 + $0x68c] ss:$16 sps:$4 sm:$0xff]   ;;  %v3321_v8 = vld [vmem:[%s4605_s2 + $0x5c8] ss:$16 sps:$4 sm:$0xff]  }
  0xc8   :  { %1949 = vmatprep.mubr.bf16.mxu1 %v3674_v25  ;;  %v3285_v25 = vld [vmem:[%s4605_s2 + $0x488] ss:$16 sps:$4 sm:$0xff]   ;;  %v3329_v10 = vld [vmem:[%s4605_s2 + $0x5ac] ss:$16 sps:$4 sm:$0xff]  }
  0xc9   :  { %1879 = vmatpush1.bf16.msra.mxu0 %v3273_v63  ;;  %v3324_v9 = vld [vmem:[%s4605_s2 + $0x7c8] ss:$16 sps:$4 sm:$0xff]   ;;  %v3332_v11 = vld [vmem:[%s4605_s2 + $0x7ac] ss:$16 sps:$4 sm:$0xff]  }
  0xca   :  { %1920 = vmatpush1.bf16.msra.mxu1 %v3276_v4  ;;  %1880 = vmatprep.subr.bf16.mxu0 %v3281_v42  ;;  %v3327_v12 = vld [vmem:[%s4605_s2 + $0x5a8] ss:$16 sps:$4 sm:$0xff]   ;;  %v3335_v14 = vld [vmem:[%s4605_s2 + $0x58c] ss:$16 sps:$4 sm:$0xff]  }
  0xcb   :  { %1921 = vmatprep.subr.bf16.mxu1 %v3284_v15  ;;  %v3330_v13 = vld [vmem:[%s4605_s2 + $0x7a8] ss:$16 sps:$4 sm:$0xff]   ;;  %v3338_v16 = vld [vmem:[%s4605_s2 + $0x78c] ss:$16 sps:$4 sm:$0xff]  }
  0xcc   :  { %v3333_v17 = vld [vmem:[%s4605_s2 + $0x588] ss:$16 sps:$4 sm:$0xff]   ;;  %v3341_v21 = vld [vmem:[%s4605_s2 + $0x56c] ss:$16 sps:$4 sm:$0xff]  }
  0xcd   :  { %1881 = vmatpush1.bf16.msra.mxu0 %v3279_v20  ;;  %v3336_v18 = vld [vmem:[%s4605_s2 + $0x788] ss:$16 sps:$4 sm:$0xff]   ;;  %v3344_v22 = vld [vmem:[%s4605_s2 + $0x76c] ss:$16 sps:$4 sm:$0xff]  }
  0xce   :  { %1922 = vmatpush1.bf16.msra.mxu1 %v3282_v43  ;;  %1882 = vmatprep.subr.bf16.mxu0 %v3287_v45  ;;  %v3339_v23 = vld [vmem:[%s4605_s2 + $0x568] ss:$16 sps:$4 sm:$0xff]   ;;  %v3347_v26 = vld [vmem:[%s4605_s2 + $0x54c] ss:$16 sps:$4 sm:$0xff]  }
  0xcf   :  { %1923 = vmatprep.subr.bf16.mxu1 %v3290_v19  ;;  %v3342_v24 = vld [vmem:[%s4605_s2 + $0x768] ss:$16 sps:$4 sm:$0xff]   ;;  %v3350_v27 = vld [vmem:[%s4605_s2 + $0x74c] ss:$16 sps:$4 sm:$0xff]  }
  0xd0   :  { %v3345_v28 = vld [vmem:[%s4605_s2 + $0x548] ss:$16 sps:$4 sm:$0xff]   ;;  %v3353_v31 = vld [vmem:[%s4605_s2 + $0x52c] ss:$16 sps:$4 sm:$0xff]  }
  0xd1   :  { %1883 = vmatpush1.bf16.msra.mxu0 %v3285_v25  ;;  %v3348_v29 = vld [vmem:[%s4605_s2 + $0x748] ss:$16 sps:$4 sm:$0xff]   ;;  %v3356_v32 = vld [vmem:[%s4605_s2 + $0x72c] ss:$16 sps:$4 sm:$0xff]  }
  0xd2   :  { %1924 = vmatpush1.bf16.msra.mxu1 %v3288_v46  ;;  %1884 = vmatprep.subr.bf16.mxu0 %v3293_v47  ;;  %v3351_v33 = vld [vmem:[%s4605_s2 + $0x528] ss:$16 sps:$4 sm:$0xff]   ;;  %v3359_v35 = vld [vmem:[%s4605_s2 + $0x50c] ss:$16 sps:$4 sm:$0xff]   ;;  %v2037_v46 = vld [vmem:[%s4607_s4 + $0x70] sm:$0xff] }
  0xd3   :  { %1925 = vmatprep.subr.bf16.mxu1 %v3296_v48  ;;  %v3354_v34 = vld [vmem:[%s4605_s2 + $0x728] ss:$16 sps:$4 sm:$0xff]   ;;  %v3362_v36 = vld [vmem:[%s4605_s2 + $0x70c] ss:$16 sps:$4 sm:$0xff]  }
  0xd4   :  { %v3357_v37 = vld [vmem:[%s4605_s2 + $0x508] ss:$16 sps:$4 sm:$0xff]  }
  0xd5   :  { %1885 = vmatpush1.bf16.msra.mxu0 %v3291_v49  ;;  %v3360_v38 = vld [vmem:[%s4605_s2 + $0x708] ss:$16 sps:$4 sm:$0xff]   ;;  %v2085_v49 = vld [vmem:[%s4607_s4 + $0x1f0] sm:$0xff] }
  0xd6   :  { %1926 = vmatpush1.bf16.msra.mxu1 %v3294_v50  ;;  %1886 = vmatprep.subr.bf16.mxu0 %v3299_v51  ;;  %v2054_v19 = vld [vmem:[%s4607_s4 + $0xf8] sm:$0xff]  ;;  %v2052_v48 = vld [vmem:[%s4607_s4 + $0xe8] sm:$0xff]  ;;  %v2069_v51 = vld [vmem:[%s4607_s4 + $0x170] sm:$0xff] }
  0xd7   :  { %1927 = vmatprep.subr.bf16.mxu1 %v3302_v52  ;;  %v2038_v25 = vld [vmem:[%s4607_s4 + $0x78] sm:$0xff]  ;;  %v2036_v50 = vld [vmem:[%s4607_s4 + $0x68] sm:$0xff] }
  0xd8   :  { %v2070_v47 = vld [vmem:[%s4607_s4 + $0x178] sm:$0xff]  ;;  %v2084_v52 = vld [vmem:[%s4607_s4 + $0x1e8] sm:$0xff] }
  0xd9   :  { %1887 = vmatpush1.bf16.msra.mxu0 %v3297_v53  ;;  %v2051_v53 = vld [vmem:[%s4607_s4 + $0xe0] sm:$0xff] }
  0xda   :  { %1928 = vmatpush1.bf16.msra.mxu1 %v3300_v54  ;;  %1888 = vmatprep.subr.bf16.mxu0 %v3305_v55  ;;  %v2068_v54 = vld [vmem:[%s4607_s4 + $0x168] sm:$0xff]  ;;  %v2035_v55 = vld [vmem:[%s4607_s4 + $0x60] sm:$0xff] }
  0xdb   :  { %1929 = vmatprep.subr.bf16.mxu1 %v3308_v56  ;;  %v2083_v56 = vld [vmem:[%s4607_s4 + $0x1e0] sm:$0xff] }
  0xdd   :  { %1889 = vmatpush1.bf16.msra.mxu0 %v3303_v57  ;;  %v2050_v57 = vld [vmem:[%s4607_s4 + $0xd8] sm:$0xff] }
  0xde   :  { %1930 = vmatpush1.bf16.msra.mxu1 %v3306_v58  ;;  %1890 = vmatprep.subr.bf16.mxu0 %v3311_v59  ;;  %v2067_v58 = vld [vmem:[%s4607_s4 + $0x160] sm:$0xff]  ;;  %v2034_v59 = vld [vmem:[%s4607_s4 + $0x58] sm:$0xff] }
  0xdf   :  { %1931 = vmatprep.subr.bf16.mxu1 %v3314_v60  ;;  %v2082_v60 = vld [vmem:[%s4607_s4 + $0x1d8] sm:$0xff] }
  0xe1   :  { %1891 = vmatpush1.bf16.msra.mxu0 %v3309_v61  ;;  %v2049_v61 = vld [vmem:[%s4607_s4 + $0xd0] sm:$0xff] }
  0xe2   :  { %1932 = vmatpush1.bf16.msra.mxu1 %v3312_v62  ;;  %1892 = vmatprep.subr.bf16.mxu0 %v3317_v1  ;;  %v2066_v62 = vld [vmem:[%s4607_s4 + $0x158] sm:$0xff]  ;;  %v2033_v1 = vld [vmem:[%s4607_s4 + $0x50] sm:$0xff] }
  0xe3   :  { %1933 = vmatprep.subr.bf16.mxu1 %v3320_v2  ;;  %v2048_v2 = vld [vmem:[%s4607_s4 + $0xc8] sm:$0xff] }
  0xe5   :  { %1893 = vmatpush2.bf16.msra.mxu0 %v3315_v3  ;;  %v2081_v3 = vld [vmem:[%s4607_s4 + $0x1d0] sm:$0xff] }
  0xe6   :  { %1934 = vmatpush2.bf16.msra.mxu1 %v3318_v5  ;;  %1894 = vmatprep.subr.bf16.mxu0 %v3323_v6 }
  0xe7   :  { %1935 = vmatprep.subr.bf16.mxu1 %v3326_v7  ;;  %v2032_v7 = vld [vmem:[%s4607_s4 + $0x48] sm:$0xff] }
  0xe9   :  { %1895 = vmatpush2.bf16.msra.mxu0 %v3321_v8  ;;  %v2065_v8 = vld [vmem:[%s4607_s4 + $0x150] sm:$0xff] }
  0xea   :  { %1936 = vmatpush2.bf16.msra.mxu1 %v3324_v9  ;;  %1896 = vmatprep.subr.bf16.mxu0 %v3329_v10  ;;  %v2047_v10 = vld [vmem:[%s4607_s4 + $0xc0] sm:$0xff] }
  0xeb   :  { %1937 = vmatprep.subr.bf16.mxu1 %v3332_v11  ;;  %v2080_v11 = vld [vmem:[%s4607_s4 + $0x1c8] sm:$0xff] }
  0xed   :  { %1897 = vmatpush2.bf16.msra.mxu0 %v3327_v12 }
  0xee   :  { %1938 = vmatpush2.bf16.msra.mxu1 %v3330_v13  ;;  %1898 = vmatprep.subr.bf16.mxu0 %v3335_v14  ;;  %v2031_v14 = vld [vmem:[%s4607_s4 + $0x40] sm:$0xff] }
  0xef   :  { %1939 = vmatprep.subr.bf16.mxu1 %v3338_v16  ;;  %v2064_v16 = vld [vmem:[%s4607_s4 + $0x148] sm:$0xff] }
  0xf1   :  { %1899 = vmatpush2.bf16.msra.mxu0 %v3333_v17 }
  0xf2   :  { %1940 = vmatpush2.bf16.msra.mxu1 %v3336_v18  ;;  %1900 = vmatprep.subr.bf16.mxu0 %v3341_v21  ;;  %v2046_v21 = vld [vmem:[%s4607_s4 + $0xb8] sm:$0xff] }
  0xf3   :  { %1941 = vmatprep.subr.bf16.mxu1 %v3344_v22  ;;  %v2079_v22 = vld [vmem:[%s4607_s4 + $0x1c0] sm:$0xff] }
  0xf5   :  { %1901 = vmatpush2.bf16.msra.mxu0 %v3339_v23 }
  0xf6   :  { %1942 = vmatpush2.bf16.msra.mxu1 %v3342_v24  ;;  %1902 = vmatprep.subr.bf16.mxu0 %v3347_v26  ;;  %v2030_v26 = vld [vmem:[%s4607_s4 + $0x38] sm:$0xff] }
  0xf7   :  { %1943 = vmatprep.subr.bf16.mxu1 %v3350_v27  ;;  %v2063_v27 = vld [vmem:[%s4607_s4 + $0x140] sm:$0xff] }
  0xf9   :  { %1903 = vmatpush2.bf16.msra.mxu0 %v3345_v28 }
  0xfa   :  { %1944 = vmatpush2.bf16.msra.mxu1 %v3348_v29  ;;  %1904 = vmatprep.subr.bf16.mxu0 %v3353_v31  ;;  %v2045_v29 = vld [vmem:[%s4607_s4 + $0xb0] sm:$0xff]  ;;  %v2078_v31 = vld [vmem:[%s4607_s4 + $0x1b8] sm:$0xff] }
  0xfb   :  { %1945 = vmatprep.subr.bf16.mxu1 %v3356_v32 }
  0xfd   :  { %1905 = vmatpush2.bf16.msra.mxu0 %v3351_v33 }
  0xfe   :  { %1946 = vmatpush2.bf16.msra.mxu1 %v3354_v34  ;;  %1906 = vmatprep.subr.bf16.mxu0 %v3359_v35  ;;  %v2029_v34 = vld [vmem:[%s4607_s4 + $0x30] sm:$0xff]  ;;  %v2062_v35 = vld [vmem:[%s4607_s4 + $0x138] sm:$0xff] }
  0xff   :  { %1947 = vmatprep.subr.bf16.mxu1 %v3362_v36 }
 0x101   :  { %1907 = vmatpush2.bf16.msra.mxu0 %v3357_v37  ;;  %v2044_v37 = vld [vmem:[%s4607_s4 + $0xa8] sm:$0xff] }
 0x102   :  { %1948 = vmatpush2.bf16.msra.mxu1 %v3360_v38  ;;  %2841 = vmatprep.subr.mxu0 %v2054_v19  ;;  %v2077_v38 = vld [vmem:[%s4607_s4 + $0x1b0] sm:$0xff] }
 0x103   :  { %v2041_v19 = vld [vmem:[%s4607_s4 + $0x90] sm:$0xff] }
 0x104   :  { %v1664_v39 = vpop.f32.mrf.mxu0  ;;  %1909 = vmatmul.mubr.bf16.vlgmr.msra.gmra.mxu0 %v3599_v0  ;;  %v2053_v0 = vld [vmem:[%s4607_s4 + $0xf0] sm:$0xff] }
 0x105   :  { %v1705_v40 = vpop.f32.mrf.mxu1  ;;  %1950 = vmatmul.mubr.bf16.vlgmr.msra.gmra.mxu1 %v3862_v30  ;;  %v2086_v30 = vld [vmem:[%s4607_s4 + $0x1f8] sm:$0xff]  ;;  %2842 = vmatpush3.msra.mxu0 %v2038_v25 }
 0x106   :  { %v1706_v41 = vadd.f32 %v1705_v40, %v1664_v39  ;;  %v1666_v63 = vpop.f32.mrf.mxu0  ;;  %2876 = vmatprep.subr.mxu1 %v2086_v30  ;;  %2843 = vmatprep.subr.mxu0 %v2053_v0  ;;  %v2028_v39 = vld [vmem:[%s4607_s4 + $0x28] sm:$0xff]  ;;  %v2061_v40 = vld [vmem:[%s4607_s4 + $0x130] sm:$0xff]  ;;  %v2074_v25 = vld [vmem:[%s4607_s4 + $0x198] sm:$0xff] }
 0x107   :  { %v1707_v4 = vpop.f32.mrf.mxu1  ;;  %2877 = vmatpush3.msra.mxu1 %v2070_v47  ;;  %2844 = vmatpush3.msra.mxu0 %v2037_v46  ;;  %v2025_v0 = vld [vmem:[%s4607_s4 + $0x10] sm:$0xff]  ;;  %v2058_v30 = vld [vmem:[%s4607_s4 + $0x118] sm:$0xff]  ;;  %v2040_v46 = vld [vmem:[%s4607_s4 + $0x88] sm:$0xff] }
 0x108   :  { %v4252_v42 = vadd.f32 %v1707_v4, %v1666_v63  ;;  %v1668_v15 = vpop.f32.mrf.mxu0  ;;  %2878 = vmatprep.subr.mxu1 %v2085_v49  ;;  %2845 = vmatprep.subr.mxu0 %v2052_v48  ;;  %v2076_v63 = vld [vmem:[%s4607_s4 + $0x1a8] sm:$0xff]  ;;  %v2027_v4 = vld [vmem:[%s4607_s4 + $0x20] sm:$0xff]  ;;  %v2073_v47 = vld [vmem:[%s4607_s4 + $0x190] sm:$0xff] }
 0x109   :  { %v1709_v20 = vpop.f32.mrf.mxu1  ;;  %2879 = vmatpush3.msra.mxu1 %v2069_v51  ;;  %2846 = vmatpush3.msra.mxu0 %v2036_v50  ;;  %v2042_v15 = vld [vmem:[%s4607_s4 + $0x98] sm:$0xff]  ;;  %v2024_v48 = vld [vmem:[%s4607_s4 + $0x8] sm:$0xff]  ;;  %v2057_v49 = vld [vmem:[%s4607_s4 + $0x110] sm:$0xff] }
 0x10a   :  { %v1669_v43 = vpop.f32.mrf.mxu0  ;;  %2880 = vmatprep.subr.mxu1 %v2084_v52  ;;  %2847 = vmatprep.subr.mxu0 %v2051_v53  ;;  %v2075_v20 = vld [vmem:[%s4607_s4 + $0x1a0] sm:$0xff]  ;;  %v2072_v51 = vld [vmem:[%s4607_s4 + $0x188] sm:$0xff] }
 0x10b   :  { %v1710_v45 = vpop.f32.mrf.mxu1  ;;  %2881 = vmatpush3.msra.mxu1 %v2068_v54  ;;  %2848 = vmatpush3.msra.mxu0 %v2035_v55  ;;  %v2026_v43 = vld [vmem:[%s4607_s4 + $0x18] sm:$0xff]  ;;  %v2039_v50 = vld [vmem:[%s4607_s4 + $0x80] sm:$0xff]  ;;  %v2056_v53 = vld [vmem:[%s4607_s4 + $0x108] sm:$0xff] }
 0x10c   :  { %2882 = vmatprep.subr.mxu1 %v2083_v56  ;;  %2849 = vmatprep.subr.mxu0 %v2050_v57  ;;  %v2059_v45 = vld [vmem:[%s4607_s4 + $0x120] sm:$0xff] }
 0x10d   :  { %2883 = vmatpush3.msra.mxu1 %v2067_v58  ;;  %2850 = vmatpush3.msra.mxu0 %v2034_v59  ;;  %v2023_v52 = vld [vmem:[%s4607_s4] sm:$0xff] }
 0x10e   :  { %2884 = vmatprep.subr.mxu1 %v2082_v60  ;;  %2851 = vmatprep.subr.mxu0 %v2049_v61  ;;  %v2071_v54 = vld [vmem:[%s4607_s4 + $0x180] sm:$0xff] }
 0x10f   :  { %2885 = vmatpush3.msra.mxu1 %v2066_v62  ;;  %2852 = vmatpush3.msra.mxu0 %v2033_v1  ;;  %v2055_v55 = vld [vmem:[%s4607_s4 + $0x100] sm:$0xff] }
 0x110   :  { %2853 = vmatprep.subr.mxu0 %v2048_v2  ;;  %2886 = vmatprep.subr.mxu1 %v2081_v3  ;;  %v1990_v3 = vsub.s32 0, %v3555_v44 }
 0x111   :  { %2854 = vmatpush3.msra.mxu0 %v2032_v7  ;;  %2887 = vmatpush3.msra.mxu1 %v2065_v8  ;;  %v2002_v7 = vsub.s32 3, %v3555_v44  ;;  %v1986_v8 = vld [vmem:[%s4606_s3] sm:$0xf] }
 0x112   :  { %2855 = vmatprep.subr.mxu0 %v2047_v10  ;;  %2888 = vmatprep.subr.mxu1 %v2080_v11  ;;  %v1991_v11 = vrot.slane %v1986_v8, %v1990_v3 }
 0x113   :  { %2856 = vmatpush3.msra.mxu0 %v2031_v14  ;;  %2889 = vmatpush3.msra.mxu1 %v2064_v16  ;;  %v2003_v14 = vrot.slane %v1986_v8, %v2002_v7 }
 0x114   :  { %2857 = vmatprep.subr.mxu0 %v2046_v21  ;;  %2890 = vmatprep.subr.mxu1 %v2079_v22 }
 0x115   :  { %2858 = vmatpush3.msra.mxu0 %v2030_v26  ;;  %2891 = vmatpush3.msra.mxu1 %v2063_v27 }
 0x116   :  { %2859 = vmatprep.subr.mxu0 %v2045_v29  ;;  %2892 = vmatprep.subr.mxu1 %v2078_v31 }
 0x117   :  { %2860 = vmatpush3.msra.mxu0 %v2029_v34  ;;  %2893 = vmatpush3.msra.mxu1 %v2062_v35 }
 0x118   :  { %2861 = vmatprep.subr.mxu0 %v2044_v37  ;;  %2894 = vmatprep.subr.mxu1 %v2077_v38 }
 0x119   :  { %2862 = vmatpush3.msra.mxu0 %v2028_v39  ;;  %2895 = vmatpush3.msra.mxu1 %v2061_v40 }
 0x11a   :  { %2896 = vmatprep.subr.mxu1 %v2076_v63 }
 0x144   :  { %v1746_v5 = vpop.f32.mrf.mxu0 }
 0x145   :  { %v1787_v6 = vpop.f32.mrf.mxu1  ;;  %v1747_v9 = vadd.f32 %v1746_v5, %v1706_v41  ;;  %v2043_v41 = vld [vmem:[%s4607_s4 + $0xa0] sm:$0xff]  ;;  %v1994_v5 = vsub.s32 1, %v3555_v44 }
 0x146   :  { %v1748_v12 = vpop.f32.mrf.mxu0  ;;  %2863 = vmatprep.subr.mxu0 %v2043_v41 }
 0x147   :  { %v1789_v13 = vpop.f32.mrf.mxu1  ;;  %v4344_v17 = vadd.f32 %v1787_v6, %v1747_v9  ;;  %v1749_v18 = vadd.f32 %v1748_v12, %v4252_v42  ;;  %v2060_v42 = vld [vmem:[%s4607_s4 + $0x128] sm:$0xff]  ;;  %2864 = vmatpush3.msra.mxu0 %v2027_v4  ;;  %v1998_v6 = vsub.s32 2, %v3555_v44  ;;  %v3390_v9 = vmov 1983009808  }
 0x148   :  { %v1750_v23 = vpop.f32.mrf.mxu0  ;;  %2897 = vmatpush3.msra.mxu1 %v2060_v42  ;;  %2865 = vmatprep.subr.mxu0 %v2042_v15  ;;  %v1965_v10 = vunpack.c.l.s4 %v3390_v9  ;;  %v1995_v12 = vrot.slane %v1986_v8, %v1994_v5  ;;  %v4528_v5 = vld [vmem:[%s4609_s6 + $0x40] sm:$0xff]  ;;  %v2265_v9 = vld [vmem:[%s4609_s6 + $0x48] sm:$0xff] }
 0x149   :  { %v1791_v24 = vpop.f32.mrf.mxu1  ;;  %v4359_v28 = vadd.f32 %v1789_v13, %v1749_v18  ;;  %2898 = vmatprep.subr.mxu1 %v2075_v20  ;;  %2866 = vmatpush3.msra.mxu0 %v2026_v43  ;;  %v1999_v13 = vrot.slane %v1986_v8, %v1998_v6 }
 0x14a   :  { %v1751_v32 = vpop.f32.mrf.mxu0  ;;  %2899 = vmatpush3.msra.mxu1 %v2059_v45  ;;  %2867 = vmatprep.subr.mxu0 %v2041_v19  ;;  %v1966_v16 = vunpack.c.0.s8 %v1965_v10  ;;  %v2004_v24 = vcombine.low %v1991_v11, %v1995_v12  ;;  %v2287_v11 = vmul.f32 %v4528_v5, %v4528_v5 }
 0x14b   :  { %v1792_v33 = vpop.f32.mrf.mxu1  ;;  %v1962_v36 = vcombine.low %v4344_v17, %v4359_v28  ;;  %2900 = vmatprep.subr.mxu1 %v2074_v25  ;;  %2868 = vmatpush3.msra.mxu0 %v2025_v0  ;;  %v2005_v26 = vcombine.low %v1999_v13, %v2003_v14  ;;  %v4472_v17 = vld [vmem:[%s4609_s6 + $0x8] sm:$0xff]  ;;  %v4477_v28 = vld [vmem:[%s4609_s6 + $0x10] sm:$0xff] }
 0x14c   :  { %2901 = vmatpush3.msra.mxu1 %v2058_v30  ;;  %2869 = vmatprep.subr.mxu0 %v2040_v46  ;;  %v1969_v31 = vsub.s32 %v1966_v16, %v3555_v44  ;;  %v4467_v46 = vld [vmem:[%s4609_s6] sm:$0xff]  ;;  %v2266_v13 = vld [vmem:[%s4609_s6 + $0x50] sm:$0xff]  ;;  %v2288_v16 = vmul.f32 %v2265_v9, %v2265_v9 }
 0x14d   :  { %2902 = vmatprep.subr.mxu1 %v2073_v47  ;;  %2870 = vmatpush3.msra.mxu0 %v2024_v48  ;;  %v4483_v47 = vld [vmem:[%s4609_s6 + $0x18] sm:$0xff]  ;;  %v4488_v48 = vld [vmem:[%s4609_s6 + $0x20] sm:$0xff] }
 0x14e   :  { %2903 = vmatpush3.msra.mxu1 %v2057_v49  ;;  %2871 = vmatprep.subr.mxu0 %v2039_v50  ;;  %v2012_v38 = vrot.slane %v2004_v24, %v1969_v31  ;;  %v2019_v39 = vrot.slane %v2005_v26, %v1969_v31  ;;  %v1970_v4 = vrot.slane %v1962_v36, %v1969_v31  ;;  %v3391_v36 = vmov 0.0   ;;  %v2268_v26 = vld [vmem:[%s4609_s6 + $0x60] sm:$0xff] }
 0x14f   :  { %2904 = vmatprep.subr.mxu1 %v2072_v51  ;;  %2872 = vmatpush3.msra.mxu0 %v2023_v52  ;;  %v2279_v49 = vmul.f32 %v4467_v46, %v4467_v46  ;;  %v2280_v50 = vmul.f32 %v4472_v17, %v4472_v17  ;;  %v2281_v51 = vmul.f32 %v4477_v28, %v4477_v28  ;;  %v2311_v24 = vsel %vm2295_vm0, %v2287_v11, 0.0 }
 0x150   :  { %2905 = vmatpush3.msra.mxu1 %v2056_v53  ;;  %v2020_v15 = vcombine.low %v2012_v38, %v2019_v39  ;;  %2930 = vmatprep.subr.mxu0 %v3391_v36  ;;  %v2282_v52 = vmul.f32 %v4483_v47, %v4483_v47  ;;  %v4502_v53 = vld [vmem:[%s4609_s6 + $0x28] sm:$0xff] }
 0x151   :  { %2906 = vmatprep.subr.mxu1 %v2071_v54  ;;  %v2296_v54 = vsel %vm2295_vm0, %v2279_v49, 0.0 }
 0x152   :  { %2907 = vmatpush3.msra.mxu1 %v2055_v55  ;;  %v2283_v55 = vmul.f32 %v4488_v48, %v4488_v48 }
 0x153   :  { %2965 = vmatprep.subr.mxu1 %v3391_v36 }
 0x154   :  { %v2303_v3 = vsel %vm2295_vm0, %v2283_v55, 0.0 }
 0x184   :  { %v1828_v56 = vpop.f32.mrf.mxu0 }
 0x185   :  { %v1869_v57 = vpop.f32.mrf.mxu1 }
 0x186   :  { %v1870_v58 = vadd.f32 %v1869_v57, %v1828_v56  ;;  %v1830_v59 = vpop.f32.mrf.mxu0  ;;  %v2297_v56 = vsel %vm2295_vm0, %v2280_v50, 0.0  ;;  %v4511_v57 = vld [vmem:[%s4609_s6 + $0x30] sm:$0xff] }
 0x187   :  { %v1871_v60 = vpop.f32.mrf.mxu1 }
 0x188   :  { %v1832_v61 = vpop.f32.mrf.mxu0  ;;  %v1872_v22 = vadd.f32 %v1871_v60, %v1830_v59  ;;  %v2284_v59 = vmul.f32 %v4502_v53, %v4502_v53  ;;  %v2299_v60 = vsel %vm2295_vm0, %v2281_v51, 0.0 }
 0x189   :  { %v1873_v62 = vpop.f32.mrf.mxu1  ;;  %v2301_v61 = vsel %vm2295_vm0, %v2282_v52, 0.0 }
 0x18a   :  { %v1833_v1 = vpop.f32.mrf.mxu0  ;;  %v4520_v62 = vld [vmem:[%s4609_s6 + $0x38] sm:$0xff]  ;;  %v2305_v8 = vsel %vm2295_vm0, %v2284_v59, 0.0 }
 0x18b   :  { %v1874_v2 = vpop.f32.mrf.mxu1  ;;  %v2286_v7 = vmul.f32 %v4520_v62, %v4520_v62 }
 0x18c   :  { %v2285_v2 = vmul.f32 %v4511_v57, %v4511_v57 }
 0x18e   :  { %v2307_v12 = vsel %vm2295_vm0, %v2285_v2, 0.0 }
 0x1c4   :  { %v1910_v18 = vpop.f32.mrf.mxu0 }
 0x1c5   :  { %v1951_v21 = vpop.f32.mrf.mxu1  ;;  %v1911_v23 = vadd.f32 %v1910_v18, %v1870_v58  ;;  %v2298_v58 = vadd.f32 %v2297_v56, %v2296_v54  ;;  %v2309_v18 = vsel %vm2295_vm0, %v2286_v7, 0.0 }
 0x1c6   :  { %v1912_v27 = vpop.f32.mrf.mxu0 }
 0x1c7   :  { %v1953_v29 = vpop.f32.mrf.mxu1  ;;  %v1913_v32 = vadd.f32 %v1912_v27, %v1872_v22  ;;  %v1952_v35 = vadd.f32 %v1951_v21, %v1911_v23  ;;  %v2300_v1 = vadd.f32 %v2299_v60, %v2298_v58  ;;  %v2267_v21 = vld [vmem:[%s4609_s6 + $0x58] sm:$0xff]  ;;  %v2289_v23 = vmul.f32 %v2266_v13, %v2266_v13 }
 0x1c8   :  { %v1914_v33 = vpop.f32.mrf.mxu0 }
 0x1c9   :  { %v1955_v34 = vpop.f32.mrf.mxu1  ;;  %v1954_v37 = vadd.f32 %v1953_v29, %v1913_v32  ;;  %v2302_v6 = vadd.f32 %v2301_v61, %v2300_v1  ;;  %v2290_v29 = vmul.f32 %v2267_v21, %v2267_v21  ;;  %v2269_v32 = vld [vmem:[%s4609_s6 + $0x68] sm:$0xff] }
 0x1ca   :  { %v1915_v40 = vpop.f32.mrf.mxu0  ;;  %v2291_v34 = vmul.f32 %v2268_v26, %v2268_v26  ;;  %v2292_v39 = vmul.f32 %v2269_v32, %v2269_v32 }
 0x1cb   :  { %v1956_v41 = vpop.f32.mrf.mxu1  ;;  %v1963_v63 = vcombine.low %v1952_v35, %v1954_v37  ;;  %v2304_v10 = vadd.f32 %v2303_v3, %v2302_v6  ;;  %v2315_v35 = vsel %vm2295_vm0, %v2289_v23, 0.0  ;;  %v2270_v37 = vld [vmem:[%s4609_s6 + $0x70] sm:$0xff]  ;;  %v2317_v40 = vsel %vm2295_vm0, %v2290_v29, 0.0 }
 0x1cc   :  { %v2271_v41 = vld [vmem:[%s4609_s6 + $0x78] sm:$0xff] }
 0x1cd   :  { %v1977_v42 = vrot.slane %v1963_v63, %v1969_v31  ;;  %v2306_v14 = vadd.f32 %v2305_v8, %v2304_v10  ;;  %v2836_v10 = vld [vmem:[%s4608_s5] ss:$0 sm:$0xff]  ;;  %s3394_s5 = smov [#allocation4]  }
 0x1ce   :  { %s2572_s21 = sshll.u32 %s3394_s5, 4  ;;  %s2573_s21 = int_to_ptr.vmem [resolvable:$true] %s2572_s21 }
 0x1cf   :  { %v1978_v20 = vcombine.low %v1970_v4, %v1977_v42  ;;  %v2308_v22 = vadd.f32 %v2307_v12, %v2306_v14  ;;  %v2293_v4 = vmul.f32 %v2270_v37, %v2270_v37  ;;  %v2319_v42 = vsel %vm2295_vm0, %v2291_v34, 0.0  ;;  %s3367_s22 = scalar_lea.vmem %s2573_s21, 128  ;;  %p3372_p1 = scmp.lt.s32.totalorder %s2573_s21, %s2573_s21 }
 0x1d0   :  { %p3368_p0 = scmp.ne.s32.totalorder %s2573_s21, %s3367_s22  ;;  %p3373_p2 = scmp.lt.s32.totalorder %s3367_s22, %s3367_s22 }
 0x1d1   :  { %v2022_v43 = vadd.f32 %v2020_v15, %v1978_v20  ;;  %v2310_v27 = vadd.f32 %v2309_v18, %v2308_v22  ;;  %v2294_v20 = vmul.f32 %v2271_v41, %v2271_v41 }
 0x1d2   :  { %p3374_p3 = por %p3373_p2, %p3372_p1 }
 0x1d3   :  { %v2102_v45 = vrot.slane %v2022_v43, %v1969_v31  ;;  %v2095_v19 = vcombine.high %v2022_v43, %v2022_v43  ;;  %v2312_v33 = vadd.f32 %v2311_v24, %v2310_v27  ;;  %v2321_v43 = vsel %vm2295_vm0, %v2292_v39, 0.0 }
 0x1d4   :  { %p3375_p4 = pnand %p3374_p3, %p3368_p0 }
 0x1d5   :  { %v2110_v25 = vcombine.high %v2102_v45, %v2102_v45  ;;  %v2109_v0 = vrot.slane %v2095_v19, %v1969_v31  ;;  %v2313_v31 = vsel %vm2295_vm0, %v2288_v16, 0.0  ;;  %v2323_v19 = vsel %vm2295_vm0, %v2293_v4, 0.0 }
 0x1d6   :  { %v2314_v38 = vadd.f32 %v2313_v31, %v2312_v33 }
 0x1d7   :  { %2180 = vmatprep.mubr.f32.mxu0 %v2110_v25  ;;  %v2111_v30 = vcombine.high %v2109_v0, %v2109_v0 }
 0x1d8   :  { %2181 = vmatmul.mubr.f32.vlgmr.msra.gmra.mxu0 %v2102_v45  ;;  %v2316_v63 = vadd.f32 %v2315_v35, %v2314_v38 }
 0x1d9   :  { %2250 = vmatprep.mubr.f32.mxu1 %v2111_v30  ;;  %2962 = vmatprep.mubr.msk.f32.mxu0 %vm3392_vm2, %v3391_v36 }
 0x1da   :  { %2251 = vmatmul.mubr.f32.vlgmr.msra.gmra.mxu1 %v2109_v0  ;;  %v2318_v15 = vadd.f32 %v2317_v40, %v2316_v63  ;;  %v2325_v0 = vsel %vm2295_vm0, %v2294_v20, 0.0  ;;  %v2840_v20 = vld [vmem:[#allocation3] ss:$0 sm:$0xff] }
 0x1db   :  { %2967 = vmatprep.mubr.msk.f32.mxu1 %vm3392_vm2, %v3391_v36 }
 0x1dc   :  { %v2320_v45 = vadd.f32 %v2319_v42, %v2318_v15 }
 0x1de   :  { %v2322_v25 = vadd.f32 %v2321_v43, %v2320_v45  ;;  %v3393_v43 = vmov 0  }
 0x1df   :  { %2976 = vset.pattern.permute.xlu1 %v3393_v43 }
 0x1e0   :  { %v2324_v30 = vadd.f32 %v2323_v19, %v2322_v25  ;;  %2561 = vperm.xlu1 %2976, %v2840_v20  }
 0x1e2   :  { %v2326_v49 = vadd.f32 %v2325_v0, %v2324_v30 }
 0x1e4   :  { %v2327_v50 = vrot.slane %v2326_v49, 4 }
 0x1e6   :  { %v2328_v51 = vadd.f32 %v2327_v50, %v2326_v49 }
 0x1e8   :  { %v2329_v52 = vrot.slane %v2328_v51, 2 }
 0x1ea   :  { %v2330_v54 = vadd.f32 %v2329_v52, %v2328_v51 }
 0x1ec   :  { %v2331_v55 = vrot.slane %v2330_v54, 1 }
 0x1ee   :  { %v2332_v56 = vadd.f32 %v2331_v55, %v2330_v54 }
 0x1f0   :  { %3363 = vrsqrt.f32 %v2332_v56 }
 0x1fd   :  { %v3364_v58 = vpop.eup %3363 }
 0x1fe   :  { %v2349_v59 = vmul.f32 %v3364_v58, %v2271_v41  ;;  %v2348_v60 = vmul.f32 %v3364_v58, %v2270_v37  ;;  %v2347_v61 = vmul.f32 %v3364_v58, %v2269_v32  ;;  %v2346_v1 = vmul.f32 %v3364_v58, %v2268_v26 }
 0x1ff   :  { %v2345_v2 = vmul.f32 %v3364_v58, %v2267_v21  ;;  %v2344_v3 = vmul.f32 %v3364_v58, %v2266_v13  ;;  %v2343_v6 = vmul.f32 %v3364_v58, %v2265_v9  ;;  %v2342_v7 = vmul.f32 %v3364_v58, %v4528_v5 }
 0x200   :  { %2931 = vmatpush3.msra.mxu0 %v2349_v59  ;;  %v2341_v22 = vmul.f32 %v3364_v58, %v4520_v62  ;;  %v2340_v23 = vmul.f32 %v3364_v58, %v4511_v57  ;;  %v2339_v24 = vmul.f32 %v3364_v58, %v4502_v53  ;;  %v2338_v26 = vmul.f32 %v3364_v58, %v4488_v48 }
 0x201   :  { %2932 = vmatprep.subr.mxu0 %v3391_v36  ;;  %v2337_v62 = vmul.f32 %v3364_v58, %v4483_v47  ;;  %v2336_v53 = vmul.f32 %v3364_v58, %v4477_v28  ;;  %v2335_v57 = vmul.f32 %v3364_v58, %v4472_v17  ;;  %v2334_v48 = vmul.f32 %v3364_v58, %v4467_v46 }
 0x202   :  { %2933 = vmatpush3.msra.mxu0 %v2348_v60 }
 0x203   :  { %2934 = vmatprep.subr.mxu0 %v3391_v36 }
 0x204   :  { %2935 = vmatpush3.msra.mxu0 %v2347_v61 }
 0x205   :  { %2936 = vmatprep.subr.mxu0 %v3391_v36 }
 0x206   :  { %2937 = vmatpush3.msra.mxu0 %v2346_v1 }
 0x207   :  { %2938 = vmatprep.subr.mxu0 %v3391_v36 }
 0x208   :  { %2939 = vmatpush3.msra.mxu0 %v2345_v2 }
 0x209   :  { %2940 = vmatprep.subr.mxu0 %v3391_v36 }
 0x20a   :  { %2941 = vmatpush3.msra.mxu0 %v2344_v3 }
 0x20b   :  { %2942 = vmatprep.subr.mxu0 %v3391_v36 }
 0x20c   :  { %2943 = vmatpush3.msra.mxu0 %v2343_v6 }
 0x20d   :  { %2944 = vmatprep.subr.mxu0 %v3391_v36 }
 0x20e   :  { %2945 = vmatpush3.msra.mxu0 %v2342_v7 }
 0x20f   :  { %2946 = vmatprep.subr.mxu0 %v3391_v36 }
 0x210   :  { %2947 = vmatpush3.msra.mxu0 %v2341_v22 }
 0x211   :  { %2948 = vmatprep.subr.mxu0 %v3391_v36 }
 0x212   :  { %2949 = vmatpush3.msra.mxu0 %v2340_v23 }
 0x213   :  { %2950 = vmatprep.subr.mxu0 %v3391_v36 }
 0x214   :  { %2951 = vmatpush3.msra.mxu0 %v2339_v24 }
 0x215   :  { %2952 = vmatprep.subr.mxu0 %v3391_v36 }
 0x216   :  { %2953 = vmatpush3.msra.mxu0 %v2338_v26 }
 0x217   :  { %2954 = vmatprep.subr.mxu0 %v3391_v36 }
 0x218   :  { %2955 = vmatpush3.msra.mxu0 %v2337_v62 }
 0x219   :  { %2956 = vmatprep.subr.mxu0 %v3391_v36 }
 0x21a   :  { %2957 = vmatpush3.msra.mxu0 %v2336_v53 }
 0x21b   :  { %2958 = vmatprep.subr.mxu0 %v3391_v36 }
 0x21c   :  { %2959 = vmatpush3.msra.mxu0 %v2335_v57 }
 0x21d   :  { %2960 = vmatprep.subr.mxu0 %v3391_v36 }
 0x21e   :  { %2961 = vmatpush3.msra.mxu0 %v2334_v48 }
 0x25b   :  { %v2562_v19 = vpop.permute.xlu1 %2561 }
 0x298   :  { %v2873_v8 = vpop.f32.mrf.mxu0 }
 0x29a   :  { %v2874_v11 = vpop.f32.mrf.mxu0  ;;  %v2908_v9 = vpop.f32.mrf.mxu1 }
 0x29b   :  { %v2875_v12 = vadd.f32 %v2874_v11, %v2873_v8 }
 0x29c   :  { %v2909_v13 = vpop.f32.mrf.mxu1 }
 0x29d   :  { %v2183_v14 = vadd.f32 %v2875_v12, %v2836_v10  ;;  %v2910_v16 = vadd.f32 %v2909_v13, %v2908_v9 }
 0x29f   :  { %v2253_v5 = vadd.f32 %v2910_v16, %v2183_v14 }
 0x2a1   :  { %v2272_v18 = vmul.f32 %v2253_v5, %v2253_v5 }
 0x2a3   :  { %v2274_v21 = vsel %vm2273_vm1, %v2272_v18, 0.0 }
 0x2a4   :  { %2275 = vadd.xlane.f32.xlu0 %v2274_v21 }
 0x32d   :  { %v2276_v47 = vpop.xlane.xlu0 %2275 }
 0x32e   :  { %3365 = vrsqrt.f32 %v2276_v47 }
 0x33b   :  { %v3366_v27 = vpop.eup %3365 }
 0x33c   :  { %v2278_v28 = vmul.f32 %v3366_v27, %v2253_v5 }
 0x33e   :  { %2963 = vmatmul.mubr.f32.vlgmr.msra.gmra.mxu0 %v2278_v28 }
 0x3fe   :  { %v2416_v29 = vpop.f32.mrf.mxu0 }
 0x3ff   :  { %v2423_v31 = vsel %vm2422_vm3, %v2416_v29, -inf  ;;  %2966 = vmatpush3.msk.msra.mxu1 %vm2273_vm1, %v2416_v29 }
 0x400   :  { %v2424_v17 = vrot.slane %v2423_v31, 4  ;;  %v2964_v32 = vpop.f32.mrf.mxu0 }
 0x402   :  { %v2425_v33 = vmax.f32 %v2423_v31, %v2424_v17 }
 0x404   :  { %v2426_v46 = vrot.slane %v2425_v33, 2 }
 0x406   :  { %v2427_v34 = vmax.f32 %v2425_v33, %v2426_v46 }
 0x408   :  { %v2428_v35 = vrot.slane %v2427_v34, 1 }
 0x40a   :  { %v2429_v37 = vmax.f32 %v2427_v34, %v2428_v35 }
 0x40c   :  { %vm2430_vm4 = vcmp.eq.f32.partialorder %v2416_v29, %v2429_v37 }
 0x40d   :  { %v2431_v38 = vsel %vm2430_vm4, %v3555_v44, 2 }
 0x40e   :  { %v2432_v39 = vsel %vm2422_vm3, %v2431_v38, 2147483647 }
 0x40f   :  { %v2433_v40 = vrot.slane %v2432_v39, 4 }
 0x411   :  { %vm2434_vm5 = vcmp.lt.s32.totalorder %v2432_v39, %v2433_v40 }
 0x412   :  { %v2435_v41 = vsel %vm2434_vm5, %v2432_v39, %v2433_v40 }
 0x413   :  { %v2436_v63 = vrot.slane %v2435_v41, 2 }
 0x415   :  { %vm2437_vm6 = vcmp.lt.s32.totalorder %v2435_v41, %v2436_v63 }
 0x416   :  { %v2438_v4 = vsel %vm2437_vm6, %v2435_v41, %v2436_v63 }
 0x417   :  { %v2439_v42 = vrot.slane %v2438_v4, 1 }
 0x419   :  { %vm2440_vm7 = vcmp.lt.s32.totalorder %v2438_v4, %v2439_v42 }
 0x41a   :  { %v2441_v15 = vsel %vm2440_vm7, %v2438_v4, %v2439_v42 }
 0x41b   :  { %vm2442_vm8 = vcmp.eq.s32.totalorder %v2431_v38, %v2441_v15 }
 0x41c   :  { %v2837_v45 = vsel %vm2442_vm8, 1.0, %v3391_v36 }
 0x41d   :  { %2445 = vxpose.xlu0.b32.start.end [1/1] (short) (narrow) %v2837_v45, 8 }
 0x446   :  { %2977 = vset.pattern.permute.xlu0 %v3393_v43 }
 0x499   :  { %v2461_v44 = vpop.trf.xlu0 }
 0x49a   :  { %2968 = vmatmul.mubr.msk.f32.vlgmr.msra.gmra.mxu1 %vm2477_vm9, %v2461_v44 }
 0x55a   :  { %v2550_v25 = vpop.f32.mrf.mxu1 }
 0x55b   :  { %v2564_v0 = vmul.f32 %v2562_v19, %v2550_v25 }
 0x55c   :  { %v2969_v30 = vpop.f32.mrf.mxu1 }
 0x55d   :  { %2565 = vst.msk [vmem:[#allocation4] sm:$0xff] %vm2295_vm0, %v2564_v0 }
 0x55e   :  { %3378 = shalt.err (!%p3375_p4)
}
 0x55f   :  { %2575 = dma.vmem_to_hbm [thread:$0]  %s2573_s21, 128, %s4610_s7, [#allocation5]  }
 0x560   :  { %3387 = dma.done.wait [#allocation5], 128  }
 0x561   :  { %3388 = vsyncadd [#allocation5], 4294967168 }
 0x562   :  { %2579 = vsyncpa [#allocation5], 1 }

</bundles_post_ra>
